<compile_context>
chip_gen: v5e
topology: v5e:2x2
jax: 0.10.0
libtpu: 0.0.40
codegen_flags: <defaults>
</compile_context>

<pallas_src>
import jax
import jax.numpy as jnp
from jax import lax
from jax.experimental import pallas as pl
from jax.experimental.pallas import tpu as pltpu

N_EMBD = 32
N_HEAD = 6
HEAD_SIZE = N_EMBD // N_HEAD   # 5  (6 * 5 = 30 != 32 — intentional quirk of the PyTorch module)
LN_EPS = 1e-5
NEG_INF = -1e30                # finite additive mask value


def _layer_norm(h, g, b):
    mu = jnp.mean(h, axis=-1, keepdims=True)
    var = jnp.mean((h - mu) ** 2, axis=-1, keepdims=True)
    return (h - mu) * lax.rsqrt(var + LN_EPS) * g + b


def block_kernel(x_ref, bias_ref,
                 ln1g_ref, ln1b_ref,
                 qk_ref, vp_ref, bp_ref,
                 ln2g_ref, ln2b_ref,
                 w1_ref, b1_ref, w2_ref, b2_ref,
                 o_ref):
    Bb, T, C = x_ref.shape
    H = qk_ref.shape[0]
    N = Bb * T

    x2 = x_ref[...].reshape(N, C)                       # merge leading dims (free)

    # ---- ln1, once for the whole slab ----
    ln1 = _layer_norm(x2, ln1g_ref[...], ln1b_ref[...])          # (N, C)

    # ---- attention with per-head folded (C,C) weights, head axis on the batch dim ----
    # qk_ref[h] = scale * Wq_h @ Wk_h^T   ->   scores_h = ln1 @ qk_h @ ln1^T
    # vp_ref[h] = Wv_h @ Wproj_h          ->   head contribution = P_h @ (ln1 @ vp_h)
    ln1_h = jnp.broadcast_to(ln1[None], (H, N, C))               # hoisted once
    a_st = jnp.einsum('hnc,hcd->hnd', ln1_h, qk_ref[...],
                      preferred_element_type=jnp.float32)        # (H, N, C)
    v_st = jnp.einsum('hnc,hcd->hnd', ln1_h, vp_ref[...],
                      preferred_element_type=jnp.float32)        # (H, N, C)

    # leading-dim reshapes only (tile-aligned when T is a sublane multiple)
    a3 = a_st.reshape(H * Bb, T, C)
    v3 = v_st.reshape(H * Bb, T, C)
    l3 = ln1_h.reshape(H * Bb, T, C)

    # (H*Bb, T, T): contract the C axis directly — no k transpose
    scores = jnp.einsum('btc,bsc->bts', a3, l3,
                        preferred_element_type=jnp.float32)
    scores = scores + bias_ref[...]                              # additive causal bias

    # softmax, once, on the stacked scores
    m = jnp.max(scores, axis=-1, keepdims=True)
    e = jnp.exp(scores - m)
    denom = jnp.sum(e, axis=-1, keepdims=True)
    p = e * pl.reciprocal(denom, approx=True)                    # EUP reciprocal

    out_all = jnp.einsum('bts,bsc->btc', p, v3,
                         preferred_element_type=jnp.float32)     # (H*Bb, T, C)

    # sum head contributions (output projection already folded into vp_ref)
    sa3 = out_all[0:Bb]
    for h in range(1, H):
        sa3 = sa3 + out_all[h * Bb:(h + 1) * Bb]
    sa = sa3.reshape(N, C) + bp_ref[...]                         # + proj bias

    x1 = x2 + sa                                                 # first residual

    # ---- ln2 + feed-forward ----
    ln2 = _layer_norm(x1, ln2g_ref[...], ln2b_ref[...])
    h1 = jnp.dot(ln2, w1_ref[...], preferred_element_type=jnp.float32) + b1_ref[...]
    h1 = jnp.maximum(h1, 0.0)                                    # ReLU
    h2 = jnp.dot(h1, w2_ref[...], preferred_element_type=jnp.float32) + b2_ref[...]

    o_ref[...] = (x1 + h2).reshape(Bb, T, C)                     # second residual


def _full_spec(shape):
    nd = len(shape)
    return pl.BlockSpec(shape, lambda i, _nd=nd: (0,) * _nd)


def _pick_block_b(B, max_bb=8):
    """Largest divisor of B <= max_bb, preferring >= 2 grid steps (keeps both v7x TCs busy)."""
    divisors = [d for d in range(1, min(B, max_bb) + 1) if B % d == 0]
    two_step = [d for d in divisors if B // d >= 2]
    return max(two_step) if two_step else max(divisors)


def block_forward(x, params, block_b=None):
    B, T, C = x.shape
    if block_b is None:
        block_b = _pick_block_b(B)
    assert B % block_b == 0

    scale = float(HEAD_SIZE) ** -0.5
    # Fold per-head projections into (C, C) matrices (tiny wrapper-side XLA work).
    qk = scale * jnp.einsum('hcd,hed->hce', params["wq"], params["wk"])   # (H, C, C)
    vp = jnp.einsum('hcd,hdf->hcf', params["wv"], params["wpt"])          # (H, C, C)

    # Additive causal bias: 0 on/below the diagonal, -1e30 above.
    row = jnp.arange(T)[:, None]
    col = jnp.arange(T)[None, :]
    bias = jnp.where(col <= row, 0.0, NEG_INF).astype(jnp.float32)        # (T, T)

    weights = [params["ln1g"], params["ln1b"], qk, vp, params["bp"],
               params["ln2g"], params["ln2b"],
               params["w1"], params["b1"], params["w2"], params["b2"]]

    x_spec = pl.BlockSpec((block_b, T, C), lambda i: (i, 0, 0))
    in_specs = [x_spec, _full_spec((T, T))] + [_full_spec(w.shape) for w in weights]

    return pl.pallas_call(
        block_kernel,
        out_shape=jax.ShapeDtypeStruct((B, T, C), jnp.float32),
        grid=(B // block_b,),
        in_specs=in_specs,
        out_specs=x_spec,
        compiler_params=pltpu.CompilerParams(dimension_semantics=("parallel",)),
    )(x, bias, *weights)


def block_forward_ref(x, p):
    """Pure-JAX reference (per-head, un-folded weights)."""
    def ln(h, g, b):
        mu = h.mean(-1, keepdims=True)
        var = ((h - mu) ** 2).mean(-1, keepdims=True)
        return (h - mu) / jnp.sqrt(var + LN_EPS) * g + b

    B, T, C = x.shape
    ln1 = ln(x, p["ln1g"], p["ln1b"])
    causal = jnp.tril(jnp.ones((T, T), bool))
    scale = HEAD_SIZE ** -0.5
    sa = jnp.zeros_like(x)
    for h in range(N_HEAD):
        q = ln1 @ p["wq"][h]
        k = ln1 @ p["wk"][h]
        v = ln1 @ p["wv"][h]
        wei = jnp.einsum("btd,bsd->bts", q, k) * scale
        wei = jnp.where(causal, wei, -jnp.inf)
        wei = jax.nn.softmax(wei, axis=-1)
        sa = sa + (wei @ v) @ p["wpt"][h]
    sa = sa + p["bp"]
    x1 = x + sa
    ln2 = ln(x1, p["ln2g"], p["ln2b"])
    h1 = jnp.maximum(ln2 @ p["w1"] + p["b1"], 0.0)
    return x1 + h1 @ p["w2"] + p["b2"]


def make_params(key):
    ks = jax.random.split(key, 8)
    f32 = jnp.float32
    return {
        "ln1g": jnp.ones((1, N_EMBD), f32),
        "ln1b": jnp.zeros((1, N_EMBD), f32),
        "wq": 0.1 * jax.random.normal(ks[0], (N_HEAD, N_EMBD, HEAD_SIZE), f32),
        "wk": 0.1 * jax.random.normal(ks[1], (N_HEAD, N_EMBD, HEAD_SIZE), f32),
        "wv": 0.1 * jax.random.normal(ks[2], (N_HEAD, N_EMBD, HEAD_SIZE), f32),
        # PyTorch proj weight is (n_embd, n_head*head_size); stored transposed and
        # split per head as (n_head, head_size, n_embd). The 6*5=30 concat width
        # (not 32) matches the original module — do not "fix" to 32.
        "wpt": 0.1 * jax.random.normal(ks[3], (N_HEAD, HEAD_SIZE, N_EMBD), f32),
        "bp": 0.1 * jax.random.normal(ks[4], (1, N_EMBD), f32),
        "ln2g": jnp.ones((1, N_EMBD), f32),
        "ln2b": jnp.zeros((1, N_EMBD), f32),
        "w1": 0.1 * jax.random.normal(ks[5], (N_EMBD, 4 * N_EMBD), f32),
        "b1": 0.1 * jax.random.normal(ks[6], (1, 4 * N_EMBD), f32),
        "w2": 0.1 * jax.random.normal(ks[7], (4 * N_EMBD, N_EMBD), f32),
        "b2": jnp.zeros((1, N_EMBD), f32),
    }


if __name__ == "__main__":
    key = jax.random.PRNGKey(0)
    k_x, k_p = jax.random.split(key)

    B, T = 8, 8          # T <= 20 (size of the tril buffer in the PyTorch module)
    x = jax.random.normal(k_x, (B, T, N_EMBD), jnp.float32)
    params = make_params(k_p)

    out = jax.block_until_ready(block_forward(x, params))   # block_b=4 -> grid of 2 steps
    ref = block_forward_ref(x, params)

    assert out.shape == (B, T, N_EMBD)
    # Tolerance loosened vs pure-f32: softmax uses the approximate EUP reciprocal and the
    # Wq@Wk^T / Wv@Wproj weight folding reorders f32 accumulation.
    assert jnp.allclose(out, ref, atol=5e-3, rtol=5e-3), "mismatch vs JAX reference"

    print("KERNEL_OK")
</pallas_src>

<mosaic_0001>
module attributes {stable_mosaic.version = 11 : i64} {
  func.func @block_kernel(%arg0: i32, %arg1: memref<4x8x32xf32, #tpu.memory_space<vmem>>, %arg2: memref<8x8xf32, #tpu.memory_space<vmem>>, %arg3: memref<1x32xf32, #tpu.memory_space<vmem>>, %arg4: memref<1x32xf32, #tpu.memory_space<vmem>>, %arg5: memref<6x32x32xf32, #tpu.memory_space<vmem>>, %arg6: memref<6x32x32xf32, #tpu.memory_space<vmem>>, %arg7: memref<1x32xf32, #tpu.memory_space<vmem>>, %arg8: memref<1x32xf32, #tpu.memory_space<vmem>>, %arg9: memref<1x32xf32, #tpu.memory_space<vmem>>, %arg10: memref<32x128xf32, #tpu.memory_space<vmem>>, %arg11: memref<1x128xf32, #tpu.memory_space<vmem>>, %arg12: memref<128x32xf32, #tpu.memory_space<vmem>>, %arg13: memref<1x32xf32, #tpu.memory_space<vmem>>, %arg14: memref<4x8x32xf32, #tpu.memory_space<vmem>>) attributes {dimension_semantics = [#tpu.dimension_semantics<parallel>], iteration_bounds = array<i64: 2>, scalar_prefetch = 0 : i64, scratch_operands = 0 : i64, tpu.core_type = #tpu.core_type<tc>, window_params = [{transform_indices = @transform_0, window_bounds = array<i64: 4, 8, 32>}, {pipeline_mode = #tpu.pipeline_mode<synchronous>, transform_indices = @transform_1, window_bounds = array<i64: 8, 8>}, {pipeline_mode = #tpu.pipeline_mode<synchronous>, transform_indices = @transform_2, window_bounds = array<i64: 1, 32>}, {pipeline_mode = #tpu.pipeline_mode<synchronous>, transform_indices = @transform_3, window_bounds = array<i64: 1, 32>}, {pipeline_mode = #tpu.pipeline_mode<synchronous>, transform_indices = @transform_4, window_bounds = array<i64: 6, 32, 32>}, {pipeline_mode = #tpu.pipeline_mode<synchronous>, transform_indices = @transform_5, window_bounds = array<i64: 6, 32, 32>}, {pipeline_mode = #tpu.pipeline_mode<synchronous>, transform_indices = @transform_6, window_bounds = array<i64: 1, 32>}, {pipeline_mode = #tpu.pipeline_mode<synchronous>, transform_indices = @transform_7, window_bounds = array<i64: 1, 32>}, {pipeline_mode = #tpu.pipeline_mode<synchronous>, transform_indices = @transform_8, window_bounds = array<i64: 1, 32>}, {pipeline_mode = #tpu.pipeline_mode<synchronous>, transform_indices = @transform_9, window_bounds = array<i64: 32, 128>}, {pipeline_mode = #tpu.pipeline_mode<synchronous>, transform_indices = @transform_10, window_bounds = array<i64: 1, 128>}, {pipeline_mode = #tpu.pipeline_mode<synchronous>, transform_indices = @transform_11, window_bounds = array<i64: 128, 32>}, {pipeline_mode = #tpu.pipeline_mode<synchronous>, transform_indices = @transform_12, window_bounds = array<i64: 1, 32>}, {transform_indices = @transform_13, window_bounds = array<i64: 4, 8, 32>}]} {
    %c0 = arith.constant 0 : index
    %c0_0 = arith.constant 0 : index
    %c0_1 = arith.constant 0 : index
    %0 = vector.load %arg1[%c0, %c0_0, %c0_1] : memref<4x8x32xf32, #tpu.memory_space<vmem>>, vector<4x8x32xf32>
    %1 = vector.shape_cast %0 : vector<4x8x32xf32> to vector<32x32xf32>
    %c0_2 = arith.constant 0 : index
    %c0_3 = arith.constant 0 : index
    %2 = vector.load %arg3[%c0_2, %c0_3] : memref<1x32xf32, #tpu.memory_space<vmem>>, vector<1x32xf32>
    %c0_4 = arith.constant 0 : index
    %c0_5 = arith.constant 0 : index
    %3 = vector.load %arg4[%c0_4, %c0_5] : memref<1x32xf32, #tpu.memory_space<vmem>>, vector<1x32xf32>
    %cst = arith.constant dense<0.000000e+00> : vector<32xf32>
    %4 = vector.multi_reduction <add>, %1, %cst [1] : vector<32x32xf32> to vector<32xf32>
    %5 = vector.shape_cast %4 : vector<32xf32> to vector<32x1xf32>
    %cst_6 = arith.constant 3.200000e+01 : f32
    %6 = vector.broadcast %cst_6 : f32 to vector<32x1xf32>
    %7 = arith.divf %5, %6 : vector<32x1xf32>
    %8 = vector.broadcast %7 : vector<32x1xf32> to vector<32x32xf32>
    %9 = arith.subf %1, %8 : vector<32x32xf32>
    %10 = arith.mulf %9, %9 : vector<32x32xf32>
    %cst_7 = arith.constant dense<0.000000e+00> : vector<32xf32>
    %11 = vector.multi_reduction <add>, %10, %cst_7 [1] : vector<32x32xf32> to vector<32xf32>
    %12 = vector.shape_cast %11 : vector<32xf32> to vector<32x1xf32>
    %cst_8 = arith.constant 3.200000e+01 : f32
    %13 = vector.broadcast %cst_8 : f32 to vector<32x1xf32>
    %14 = arith.divf %12, %13 : vector<32x1xf32>
    %15 = vector.broadcast %7 : vector<32x1xf32> to vector<32x32xf32>
    %16 = arith.subf %1, %15 : vector<32x32xf32>
    %cst_9 = arith.constant 9.99999974E-6 : f32
    %17 = vector.broadcast %cst_9 : f32 to vector<32x1xf32>
    %18 = arith.addf %14, %17 : vector<32x1xf32>
    %19 = math.rsqrt %18 : vector<32x1xf32>
    %20 = vector.broadcast %19 : vector<32x1xf32> to vector<32x32xf32>
    %21 = arith.mulf %16, %20 : vector<32x32xf32>
    %22 = vector.broadcast %2 : vector<1x32xf32> to vector<32x32xf32>
    %23 = arith.mulf %21, %22 : vector<32x32xf32>
    %24 = vector.broadcast %3 : vector<1x32xf32> to vector<32x32xf32>
    %25 = arith.addf %23, %24 : vector<32x32xf32>
    %26 = vector.shape_cast %25 : vector<32x32xf32> to vector<1x32x32xf32>
    %27 = vector.shape_cast %26 : vector<1x32x32xf32> to vector<1x32x32xf32>
    %28 = vector.broadcast %27 : vector<1x32x32xf32> to vector<6x32x32xf32>
    %c0_10 = arith.constant 0 : index
    %c0_11 = arith.constant 0 : index
    %c0_12 = arith.constant 0 : index
    %29 = vector.load %arg5[%c0_10, %c0_11, %c0_12] : memref<6x32x32xf32, #tpu.memory_space<vmem>>, vector<6x32x32xf32>
    "tpu.trace_start"() <{level = 10 : i32, message = "hnc,hcd->hnd"}> : () -> ()
    %cst_13 = arith.constant dense<0.000000e+00> : vector<6x32x32xf32>
    %30 = tpu.matmul %28, %29, %cst_13 {dimension_numbers = #tpu.dot_dimension_numbers<[2], [1], [1], [2], [0, 0, 0, 1, 1, 2], [0], [0]>} : vector<6x32x32xf32>, vector<6x32x32xf32>, vector<6x32x32xf32> -> vector<6x32x32xf32>
    "tpu.trace_stop"() : () -> ()
    %c0_14 = arith.constant 0 : index
    %c0_15 = arith.constant 0 : index
    %c0_16 = arith.constant 0 : index
    %31 = vector.load %arg6[%c0_14, %c0_15, %c0_16] : memref<6x32x32xf32, #tpu.memory_space<vmem>>, vector<6x32x32xf32>
    "tpu.trace_start"() <{level = 10 : i32, message = "hnc,hcd->hnd"}> : () -> ()
    %cst_17 = arith.constant dense<0.000000e+00> : vector<6x32x32xf32>
    %32 = tpu.matmul %28, %31, %cst_17 {dimension_numbers = #tpu.dot_dimension_numbers<[2], [1], [1], [2], [0, 0, 0, 1, 1, 2], [0], [0]>} : vector<6x32x32xf32>, vector<6x32x32xf32>, vector<6x32x32xf32> -> vector<6x32x32xf32>
    "tpu.trace_stop"() : () -> ()
    %33 = vector.shape_cast %30 : vector<6x32x32xf32> to vector<24x8x32xf32>
    %34 = vector.shape_cast %32 : vector<6x32x32xf32> to vector<24x8x32xf32>
    %35 = vector.shape_cast %28 : vector<6x32x32xf32> to vector<24x8x32xf32>
    "tpu.trace_start"() <{level = 10 : i32, message = "btc,bsc->bts"}> : () -> ()
    %cst_18 = arith.constant dense<0.000000e+00> : vector<24x8x8xf32>
    %36 = tpu.matmul %33, %35, %cst_18 {dimension_numbers = #tpu.dot_dimension_numbers<[2], [2], [1], [1], [0, 0, 0, 1, 1, 1], [0], [0]>} : vector<24x8x32xf32>, vector<24x8x32xf32>, vector<24x8x8xf32> -> vector<24x8x8xf32>
    "tpu.trace_stop"() : () -> ()
    %c0_19 = arith.constant 0 : index
    %c0_20 = arith.constant 0 : index
    %37 = vector.load %arg2[%c0_19, %c0_20] : memref<8x8xf32, #tpu.memory_space<vmem>>, vector<8x8xf32>
    %38 = vector.shape_cast %37 : vector<8x8xf32> to vector<1x8x8xf32>
    %39 = vector.broadcast %38 : vector<1x8x8xf32> to vector<24x8x8xf32>
    %40 = arith.addf %36, %39 : vector<24x8x8xf32>
    %cst_21 = arith.constant dense<0xFF800000> : vector<24x8xf32>
    %41 = vector.multi_reduction <maximumf>, %40, %cst_21 [2] : vector<24x8x8xf32> to vector<24x8xf32>
    %42 = vector.shape_cast %41 : vector<24x8xf32> to vector<24x8x1xf32>
    %43 = vector.broadcast %42 : vector<24x8x1xf32> to vector<24x8x8xf32>
    %44 = arith.subf %40, %43 : vector<24x8x8xf32>
    %45 = math.exp %44 : vector<24x8x8xf32>
    %cst_22 = arith.constant dense<0.000000e+00> : vector<24x8xf32>
    %46 = vector.multi_reduction <add>, %45, %cst_22 [2] : vector<24x8x8xf32> to vector<24x8xf32>
    %47 = vector.shape_cast %46 : vector<24x8xf32> to vector<24x8x1xf32>
    %48 = tpu.reciprocal %47 {approx = true} : vector<24x8x1xf32> -> vector<24x8x1xf32>
    %49 = vector.broadcast %48 : vector<24x8x1xf32> to vector<24x8x8xf32>
    %50 = arith.mulf %45, %49 : vector<24x8x8xf32>
    "tpu.trace_start"() <{level = 10 : i32, message = "bts,bsc->btc"}> : () -> ()
    %cst_23 = arith.constant dense<0.000000e+00> : vector<24x8x32xf32>
    %51 = tpu.matmul %50, %34, %cst_23 {dimension_numbers = #tpu.dot_dimension_numbers<[2], [1], [1], [2], [0, 0, 0, 1, 1, 2], [0], [0]>} : vector<24x8x8xf32>, vector<24x8x32xf32>, vector<24x8x32xf32> -> vector<24x8x32xf32>
    "tpu.trace_stop"() : () -> ()
    %52 = vector.extract_strided_slice %51 {offsets = [0, 0, 0], sizes = [4, 8, 32], strides = [1, 1, 1]} : vector<24x8x32xf32> to vector<4x8x32xf32>
    %53 = vector.extract_strided_slice %51 {offsets = [4, 0, 0], sizes = [4, 8, 32], strides = [1, 1, 1]} : vector<24x8x32xf32> to vector<4x8x32xf32>
    %54 = arith.addf %52, %53 : vector<4x8x32xf32>
    %55 = vector.extract_strided_slice %51 {offsets = [8, 0, 0], sizes = [4, 8, 32], strides = [1, 1, 1]} : vector<24x8x32xf32> to vector<4x8x32xf32>
    %56 = arith.addf %54, %55 : vector<4x8x32xf32>
    %57 = vector.extract_strided_slice %51 {offsets = [12, 0, 0], sizes = [4, 8, 32], strides = [1, 1, 1]} : vector<24x8x32xf32> to vector<4x8x32xf32>
    %58 = arith.addf %56, %57 : vector<4x8x32xf32>
    %59 = vector.extract_strided_slice %51 {offsets = [16, 0, 0], sizes = [4, 8, 32], strides = [1, 1, 1]} : vector<24x8x32xf32> to vector<4x8x32xf32>
    %60 = arith.addf %58, %59 : vector<4x8x32xf32>
    %61 = vector.extract_strided_slice %51 {offsets = [20, 0, 0], sizes = [4, 8, 32], strides = [1, 1, 1]} : vector<24x8x32xf32> to vector<4x8x32xf32>
    %62 = arith.addf %60, %61 : vector<4x8x32xf32>
    %63 = vector.shape_cast %62 : vector<4x8x32xf32> to vector<32x32xf32>
    %c0_24 = arith.constant 0 : index
    %c0_25 = arith.constant 0 : index
    %64 = vector.load %arg7[%c0_24, %c0_25] : memref<1x32xf32, #tpu.memory_space<vmem>>, vector<1x32xf32>
    %65 = vector.broadcast %64 : vector<1x32xf32> to vector<32x32xf32>
    %66 = arith.addf %63, %65 : vector<32x32xf32>
    %67 = arith.addf %1, %66 : vector<32x32xf32>
    %c0_26 = arith.constant 0 : index
    %c0_27 = arith.constant 0 : index
    %68 = vector.load %arg8[%c0_26, %c0_27] : memref<1x32xf32, #tpu.memory_space<vmem>>, vector<1x32xf32>
    %c0_28 = arith.constant 0 : index
    %c0_29 = arith.constant 0 : index
    %69 = vector.load %arg9[%c0_28, %c0_29] : memref<1x32xf32, #tpu.memory_space<vmem>>, vector<1x32xf32>
    %cst_30 = arith.constant dense<0.000000e+00> : vector<32xf32>
    %70 = vector.multi_reduction <add>, %67, %cst_30 [1] : vector<32x32xf32> to vector<32xf32>
    %71 = vector.shape_cast %70 : vector<32xf32> to vector<32x1xf32>
    %cst_31 = arith.constant 3.200000e+01 : f32
    %72 = vector.broadcast %cst_31 : f32 to vector<32x1xf32>
    %73 = arith.divf %71, %72 : vector<32x1xf32>
    %74 = vector.broadcast %73 : vector<32x1xf32> to vector<32x32xf32>
    %75 = arith.subf %67, %74 : vector<32x32xf32>
    %76 = arith.mulf %75, %75 : vector<32x32xf32>
    %cst_32 = arith.constant dense<0.000000e+00> : vector<32xf32>
    %77 = vector.multi_reduction <add>, %76, %cst_32 [1] : vector<32x32xf32> to vector<32xf32>
    %78 = vector.shape_cast %77 : vector<32xf32> to vector<32x1xf32>
    %cst_33 = arith.constant 3.200000e+01 : f32
    %79 = vector.broadcast %cst_33 : f32 to vector<32x1xf32>
    %80 = arith.divf %78, %79 : vector<32x1xf32>
    %81 = vector.broadcast %73 : vector<32x1xf32> to vector<32x32xf32>
    %82 = arith.subf %67, %81 : vector<32x32xf32>
    %cst_34 = arith.constant 9.99999974E-6 : f32
    %83 = vector.broadcast %cst_34 : f32 to vector<32x1xf32>
    %84 = arith.addf %80, %83 : vector<32x1xf32>
    %85 = math.rsqrt %84 : vector<32x1xf32>
    %86 = vector.broadcast %85 : vector<32x1xf32> to vector<32x32xf32>
    %87 = arith.mulf %82, %86 : vector<32x32xf32>
    %88 = vector.broadcast %68 : vector<1x32xf32> to vector<32x32xf32>
    %89 = arith.mulf %87, %88 : vector<32x32xf32>
    %90 = vector.broadcast %69 : vector<1x32xf32> to vector<32x32xf32>
    %91 = arith.addf %89, %90 : vector<32x32xf32>
    %c0_35 = arith.constant 0 : index
    %c0_36 = arith.constant 0 : index
    %92 = vector.load %arg10[%c0_35, %c0_36] : memref<32x128xf32, #tpu.memory_space<vmem>>, vector<32x128xf32>
    %cst_37 = arith.constant dense<0.000000e+00> : vector<32x128xf32>
    %93 = tpu.matmul %91, %92, %cst_37 {dimension_numbers = #tpu.dot_dimension_numbers<[1], [0], [0], [1], [0, 0, 1, 1], [], []>} : vector<32x32xf32>, vector<32x128xf32>, vector<32x128xf32> -> vector<32x128xf32>
    %c0_38 = arith.constant 0 : index
    %c0_39 = arith.constant 0 : index
    %94 = vector.load %arg11[%c0_38, %c0_39] : memref<1x128xf32, #tpu.memory_space<vmem>>, vector<1x128xf32>
    %95 = vector.broadcast %94 : vector<1x128xf32> to vector<32x128xf32>
    %96 = arith.addf %93, %95 : vector<32x128xf32>
    %cst_40 = arith.constant 0.000000e+00 : f32
    %97 = vector.broadcast %cst_40 : f32 to vector<32x128xf32>
    %98 = arith.maximumf %96, %97 : vector<32x128xf32>
    %c0_41 = arith.constant 0 : index
    %c0_42 = arith.constant 0 : index
    %99 = vector.load %arg12[%c0_41, %c0_42] : memref<128x32xf32, #tpu.memory_space<vmem>>, vector<128x32xf32>
    %cst_43 = arith.constant dense<0.000000e+00> : vector<32x32xf32>
    %100 = tpu.matmul %98, %99, %cst_43 {dimension_numbers = #tpu.dot_dimension_numbers<[1], [0], [0], [1], [0, 0, 1, 1], [], []>} : vector<32x128xf32>, vector<128x32xf32>, vector<32x32xf32> -> vector<32x32xf32>
    %c0_44 = arith.constant 0 : index
    %c0_45 = arith.constant 0 : index
    %101 = vector.load %arg13[%c0_44, %c0_45] : memref<1x32xf32, #tpu.memory_space<vmem>>, vector<1x32xf32>
    %102 = vector.broadcast %101 : vector<1x32xf32> to vector<32x32xf32>
    %103 = arith.addf %100, %102 : vector<32x32xf32>
    %104 = arith.addf %67, %103 : vector<32x32xf32>
    %105 = vector.shape_cast %104 : vector<32x32xf32> to vector<4x8x32xf32>
    %c0_46 = arith.constant 0 : index
    %c0_47 = arith.constant 0 : index
    %c0_48 = arith.constant 0 : index
    %106 = vector.load %arg14[%c0_46, %c0_47, %c0_48] : memref<4x8x32xf32, #tpu.memory_space<vmem>>, vector<4x8x32xf32>
    tpu.vector_store %arg14[%c0_46, %c0_47, %c0_48], %105 {strides = array<i32>} : memref<4x8x32xf32, #tpu.memory_space<vmem>>, vector<4x8x32xf32>,
    return
  }
  func.func @transform_0(%arg0: i32) -> (i32, i32, i32) {
    %c0_i32 = arith.constant 0 : i32
    %c0_i32_0 = arith.constant 0 : i32
    %c0_i32_1 = arith.constant 0 : i32
    return %arg0, %c0_i32, %c0_i32_0 : i32, i32, i32
  }
  func.func @transform_1(%arg0: i32) -> (i32, i32) {
    %c0_i32 = arith.constant 0 : i32
    %c0_i32_0 = arith.constant 0 : i32
    %c0_i32_1 = arith.constant 0 : i32
    return %c0_i32, %c0_i32_0 : i32, i32
  }
  func.func @transform_2(%arg0: i32) -> (i32, i32) {
    %c0_i32 = arith.constant 0 : i32
    %c0_i32_0 = arith.constant 0 : i32
    %c0_i32_1 = arith.constant 0 : i32
    return %c0_i32, %c0_i32_0 : i32, i32
  }
  func.func @transform_3(%arg0: i32) -> (i32, i32) {
    %c0_i32 = arith.constant 0 : i32
    %c0_i32_0 = arith.constant 0 : i32
    %c0_i32_1 = arith.constant 0 : i32
    return %c0_i32, %c0_i32_0 : i32, i32
  }
  func.func @transform_4(%arg0: i32) -> (i32, i32, i32) {
    %c0_i32 = arith.constant 0 : i32
    %c0_i32_0 = arith.constant 0 : i32
    %c0_i32_1 = arith.constant 0 : i32
    %c0_i32_2 = arith.constant 0 : i32
    return %c0_i32, %c0_i32_0, %c0_i32_1 : i32, i32, i32
  }
  func.func @transform_5(%arg0: i32) -> (i32, i32, i32) {
    %c0_i32 = arith.constant 0 : i32
    %c0_i32_0 = arith.constant 0 : i32
    %c0_i32_1 = arith.constant 0 : i32
    %c0_i32_2 = arith.constant 0 : i32
    return %c0_i32, %c0_i32_0, %c0_i32_1 : i32, i32, i32
  }
  func.func @transform_6(%arg0: i32) -> (i32, i32) {
    %c0_i32 = arith.constant 0 : i32
    %c0_i32_0 = arith.constant 0 : i32
    %c0_i32_1 = arith.constant 0 : i32
    return %c0_i32, %c0_i32_0 : i32, i32
  }
  func.func @transform_7(%arg0: i32) -> (i32, i32) {
    %c0_i32 = arith.constant 0 : i32
    %c0_i32_0 = arith.constant 0 : i32
    %c0_i32_1 = arith.constant 0 : i32
    return %c0_i32, %c0_i32_0 : i32, i32
  }
  func.func @transform_8(%arg0: i32) -> (i32, i32) {
    %c0_i32 = arith.constant 0 : i32
    %c0_i32_0 = arith.constant 0 : i32
    %c0_i32_1 = arith.constant 0 : i32
    return %c0_i32, %c0_i32_0 : i32, i32
  }
  func.func @transform_9(%arg0: i32) -> (i32, i32) {
    %c0_i32 = arith.constant 0 : i32
    %c0_i32_0 = arith.constant 0 : i32
    %c0_i32_1 = arith.constant 0 : i32
    return %c0_i32, %c0_i32_0 : i32, i32
  }
  func.func @transform_10(%arg0: i32) -> (i32, i32) {
    %c0_i32 = arith.constant 0 : i32
    %c0_i32_0 = arith.constant 0 : i32
    %c0_i32_1 = arith.constant 0 : i32
    return %c0_i32, %c0_i32_0 : i32, i32
  }
  func.func @transform_11(%arg0: i32) -> (i32, i32) {
    %c0_i32 = arith.constant 0 : i32
    %c0_i32_0 = arith.constant 0 : i32
    %c0_i32_1 = arith.constant 0 : i32
    return %c0_i32, %c0_i32_0 : i32, i32
  }
  func.func @transform_12(%arg0: i32) -> (i32, i32) {
    %c0_i32 = arith.constant 0 : i32
    %c0_i32_0 = arith.constant 0 : i32
    %c0_i32_1 = arith.constant 0 : i32
    return %c0_i32, %c0_i32_0 : i32, i32
  }
  func.func @transform_13(%arg0: i32) -> (i32, i32, i32) {
    %c0_i32 = arith.constant 0 : i32
    %c0_i32_0 = arith.constant 0 : i32
    %c0_i32_1 = arith.constant 0 : i32
    return %arg0, %c0_i32, %c0_i32_0 : i32, i32, i32
  }
}

</mosaic_0001>

<bundles_post_ra>
// kernel: tpu_custom_call.1
= control target key start
LH: loop header
LB: loop body
LE: loop exit
PB: predicated region body
PF: predicated region fallthrough
CT: control target
= control target key end

     0   :  { %18 = vsyncpa [#allocation3], 0  ;;  %s4096_s0 = inlined_call_operand.vmem [shape: f32[8,8,32], index: 0, kind: input, shape index: {}]   ;;  %s4097_s1 = inlined_call_operand.vmem [shape: f32[8,8], index: 1, kind: input, shape index: {}]   ;;  %s4098_s2 = inlined_call_operand.vmem [shape: f32[1,32], index: 2, kind: input, shape index: {}]   ;;  %s4099_s3 = inlined_call_operand.vmem [shape: f32[1,32], index: 3, kind: input, shape index: {}]   ;;  %s4100_s4 = inlined_call_operand.hbm [shape: f32[6,32,32], index: 4, kind: input, shape index: {}]   ;;  %s4101_s5 = inlined_call_operand.hbm [shape: f32[6,32,32], index: 5, kind: input, shape index: {}]   ;;  %s4102_s6 = inlined_call_operand.vmem [shape: f32[1,32], index: 6, kind: input, shape index: {}]   ;;  %s4103_s7 = inlined_call_operand.vmem [shape: f32[1,32], index: 7, kind: input, shape index: {}]   ;;  %s4104_s8 = inlined_call_operand.vmem [shape: f32[1,32], index: 8, kind: input, shape index: {}]   ;;  %s4105_s9 = inlined_call_operand.vmem [shape: f32[32,128], index: 9, kind: input, shape index: {}]   ;;  %s4106_s10 = inlined_call_operand.vmem [shape: f32[1,128], index: 10, kind: input, shape index: {}]   ;;  %s4107_s11 = inlined_call_operand.vmem [shape: f32[128,32], index: 11, kind: input, shape index: {}]   ;;  %s4108_s12 = inlined_call_operand.vmem [shape: f32[1,32], index: 12, kind: input, shape index: {}]   ;;  %s4109_s13 = inlined_call_operand.hbm [shape: f32[8,8,32], index: 13, kind: output, shape index: {}]  }
   0x1   :  { %19 = vsyncpa [#allocation6], 0 }
   0x2   :  { %20 = vsyncpa [#allocation4], 0 }
   0x3   :  { %22 = vsyncpa [#allocation4 + $0x1], 0  ;;  %s3264_s25 = smov 0   ;;  %s3266_s26 = smov 0  }
   0x4   :  { %s3268_s27 = smov 0   ;;  %s3270_s28 = smov 0  }
   0x5 LB: > { %4114 = sst [smem:[#allocation11_spill]] %s3181_s27  ;;  %s3285_s29 = sadd.s32 4294967295, %s3185_s28   ;;  %s3185_s28 = sphi %s3270_s28, %s4122_s28   ;;  %s3181_s27 = sphi %s3268_s27, %s4124_s27   ;;  %s3177_s26 = sphi %s3266_s26, %s4126_s26   ;;  %s3173_s25 = sphi %s3264_s25, %s4125_s25  }
   0x6   : > { %s2716_s30 = sadd.s32 4294967294, %s3185_s28   ;;  %s3289_s14 = sadd.s32 1, %s3185_s28  }
   0x7   : > { %4115 = sst [smem:[#allocation12_spill]] %s3289_s14  ;;  %s313_s15 = sadd.s32 1, %s3181_s27 }
   0x8   : > { %s310_s16 = ssub.s32 %s3185_s28, %s3289_s14  ;;  %p323_p0 = scmp.ne.s32.totalorder %s3181_s27, %s3177_s26 }
   0x9   : > { %p311_p1 = scmp.eq.s32.totalorder %s310_s16, 0  ;;  %p324_p2 = scmp.eq.s32.totalorder %s3285_s29, 1 }
   0xa   : > { %p329_p3 = scmp.ne.s32.totalorder %s3177_s26, %s3173_s25  ;;  %p330_p4 = scmp.eq.s32.totalorder %s2716_s30, 1 }
   0xb   : > { %s3300_s17 = scalar_select %p311_p1, %s3181_s27, %s313_s15  }
   0xc   : > { %p3302_p5 = por %p324_p2, %p323_p0  ;;  %p3306_p6 = por %p330_p4, %p329_p3 }
   0xd   : > { %4116 = sst [smem:[#allocation13_spill]] %s3300_s17  ;;  %p2717_p7 = scmp.ge.s32.totalorder %s3185_s28, 1 }
   0xe   : > { %s4118_s19 = scalar_select %p3306_p6, 1, 0 }
   0xf   : > { %p337_p8 = scmp.lt.s32.totalorder %s3185_s28, 3  ;;  %p2886_p9 = scmp.eq.s32.totalorder %s3285_s29, 0 }
  0x10   : > { %4119 = sst [smem:[#allocation14_spill]] %s4118_s19  ;;  %s357_s23 = sshll.u32 %s4100_s4, 4  ;;  %s358_s23 = int_to_ptr.hbm [resolvable:$true] %s357_s23 }
  0x11   : > { %p3313_p10 = pnand %p2717_p7, %p337_p8  ;;  %s3187_s24 = smov [#allocation2]  }
  0x12   : > { %s359_s30 = sshll.u32 %s3187_s24, 4  ;;  %s371_s17 = sshll.u32 %s4101_s5, 4  ;;  %s360_s30 = int_to_ptr.vmem [resolvable:$true] %s359_s30  ;;  %s372_s17 = int_to_ptr.hbm [resolvable:$true] %s371_s17 }
  0x13   : > { %p2875_p11 = pneg %p3313_p10  ;;  %s3188_s27 = smov 128  }
  0x14   : > { %s3189_s14 = smov 8   ;;  %s3190_s19 = smov [#allocation5]  }
  0x15   : > { %p2876_p12 = pnand %p2886_p9, %p2875_p11  ;;  %s373_s21 = sshll.u32 %s3190_s19, 4  ;;  %s374_s21 = int_to_ptr.vmem [resolvable:$true] %s373_s21 }
  0x16   : > { %419 = sbr.rel (%p3313_p10) target bundleno = 1578 (0x62a), region = 72 }
  0x17   : > { %2878 = dma.hbm_to_vmem [thread:$0]  (!%p2876_p12), %s358_s23, 3072, %s360_s30, [#allocation3], %s3188_s27, %s3188_s27, %s3189_s14  }
  0x18   : > { %2881 = dma.hbm_to_vmem [thread:$0]  (!%p2876_p12), %s372_s17, 3072, %s374_s21, [#allocation6], %s3188_s27, %s3188_s27, %s3189_s14  }
  0x1b   : > { %3160 = dma.done.wait (%p2886_p9), [#allocation3], 3072  }
  0x1c   : > { %3162 = vsyncadd (%p2886_p9), [#allocation3], 4294964224 }
  0x1d   : > { %3164 = dma.done.wait (%p2886_p9), [#allocation6], 3072  }
  0x1e   : > { %3166 = vsyncadd (%p2886_p9), [#allocation6], 4294964224  ;;  %s2725_s22 = sshll.u32 %s3285_s29, 2  ;;  %vm482_vm0 = vcmask 261120   ;;  %v3191_v8 = vmov 32.0   ;;  %v595_v35 = vld [vmem:[#allocation2 + $0x18] sm:$0xff] }
  0x1f   : > { %p470_p13 = scmp.lt.s32.totalorder %s2725_s22, 7  ;;  %2937 = vrcp.f32 %v3191_v8  ;;  %v599_v36 = vld [vmem:[#allocation2 + $0x38] sm:$0xff]  ;;  %2857 = vmatpush.msra.mxu3 %v595_v35  ;;  %v594_v38 = vld [vmem:[#allocation2 + $0x10] sm:$0xff]  ;;  %640 = vmatpush.msra.mxu0 %v595_v35  ;;  %v593_v41 = vld [vmem:[#allocation2 + $0x8] sm:$0xff]  ;;  %vm1553_vm14 = vcmask 64512   ;;  %s466_s21 = sand.u32 1, %s3177_s26  }
  0x20   : > { %2861 = vmatpush.msra.mxu2 %v599_v36  ;;  %v615_v37 = vld [vmem:[#allocation2 + $0xb8] sm:$0xff]  ;;  %v598_v39 = vld [vmem:[#allocation2 + $0x30] sm:$0xff]  ;;  %v597_v42 = vld [vmem:[#allocation2 + $0x28] sm:$0xff]  ;;  %s2724_s14 = sshll.u32 %s466_s21, 5 }
  0x21   : > { %s4128_s22 = smov (!%p470_p13, %s2725_s22), 7  ;;  %785 = vmatpush.msra.mxu1 %v615_v37  ;;  %2858 = vmatpush.msra.mxu3 %v594_v38  ;;  %v614_v40 = vld [vmem:[#allocation2 + $0xb0] sm:$0xff]  ;;  %v613_v43 = vld [vmem:[#allocation2 + $0xa8] sm:$0xff]  ;;  %v592_v44 = vld [vmem:[#allocation2] sm:$0xff]  ;;  %s468_s17 = scalar_lea.vmem [#allocation7], %s2724_s14 }
  0x22   : > { %s2726_s27 = sshll.u32 %s4128_s22, 3  ;;  %2862 = vmatpush.msra.mxu2 %v598_v39  ;;  %641 = vmatpush.msra.mxu0 %v594_v38  ;;  %v596_v45 = vld [vmem:[#allocation2 + $0x20] sm:$0xff]  ;;  %v817_v47 = vld [vmem:[#allocation5 + $0x78] sm:$0xff]  ;;  %v816_v50 = vld [vmem:[#allocation5 + $0x70] sm:$0xff]  ;;  %s2629_s30 = sshll.u32 %s468_s17, 4  ;;  %s2630_s30 = int_to_ptr.vmem [resolvable:$true] %s2629_s30 }
  0x23   : > { %s3341_s19 = scalar_lea.vmem %s4096_s0, %s2726_s27  ;;  %786 = vmatpush.msra.mxu1 %v614_v40  ;;  %2859 = vmatpush.msra.mxu3 %v593_v41  ;;  %v612_v46 = vld [vmem:[#allocation2 + $0xa0] sm:$0xff]  ;;  %v815_v53 = vld [vmem:[#allocation5 + $0x68] sm:$0xff]  ;;  %v603_v56 = vld [vmem:[#allocation2 + $0x58] sm:$0xff] }
  0x24   : > { %v479_v0 = vld [vmem:[%s3341_s19 + $0x18] sm:$0xff]  ;;  %v477_v1 = vld [vmem:[%s3341_s19 + $0x8] sm:$0xff]  ;;  %v478_v4 = vld [vmem:[%s3341_s19 + $0x10] sm:$0xff]  ;;  %2863 = vmatpush.msra.mxu2 %v597_v42  ;;  %642 = vmatpush.msra.mxu0 %v593_v41 }
  0x25   : > { %v492_v2 = vsel %vm482_vm0, %v479_v0, 0.0  ;;  %v486_v3 = vsel %vm482_vm0, %v477_v1, 0.0  ;;  %v476_v5 = vld [vmem:[%s3341_s19] sm:$0xff]  ;;  %v489_v6 = vsel %vm482_vm0, %v478_v4, 0.0  ;;  %v2938_v9 = vpop.eup %2937  ;;  %787 = vmatpush.msra.mxu1 %v613_v43  ;;  %2860 = vmatpush.msra.mxu3 %v592_v44  ;;  %v602_v57 = vld [vmem:[#allocation2 + $0x50] sm:$0xff]  ;;  %v601_v59 = vld [vmem:[#allocation2 + $0x48] sm:$0xff] }
  0x26   : > { %493 = vadd.xlane.f32.xlu1 %v492_v2  ;;  %487 = vadd.xlane.f32.xlu0 %v486_v3  ;;  %v483_v7 = vsel %vm482_vm0, %v476_v5, 0.0  ;;  %v496_v10 = vmul.f32 32.0, %v2938_v9  ;;  %vm500_vm1 = vweird.f32 %v2938_v9  ;;  %v814_v58 = vld [vmem:[#allocation5 + $0x60] sm:$0xff] }
  0x27   : > { %2864 = vmatpush.msra.mxu2 %v596_v45  ;;  %788 = vmatpush.msra.mxu1 %v612_v46 }
  0x28   : > { %v497_v11 = vsub.f32 1.0, %v496_v10  ;;  %643 = vmatpush.msra.mxu0 %v592_v44  ;;  %v600_v10 = vld [vmem:[#allocation2 + $0x40] sm:$0xff] }
  0x29   : > { %925 = vmatpush.msrb.mxu1 %v817_v47  ;;  %698 = vmatpush.msrb.mxu2 %v603_v56  ;;  %v803_v56 = vld [vmem:[#allocation5 + $0x8] sm:$0xff] }
  0x2a   : > { %v498_v12 = vmul.f32 %v2938_v9, %v497_v11  ;;  %669 = vmatpush.msrb.mxu0 %v599_v36  ;;  %v606_v11 = vld [vmem:[#allocation2 + $0x70] sm:$0xff] }
  0x2b   : > { %926 = vmatpush.msrb.mxu1 %v816_v50  ;;  %699 = vmatpush.msrb.mxu2 %v602_v57  ;;  %v807_v57 = vld [vmem:[#allocation5 + $0x28] sm:$0xff] }
  0x2c   : > { %v499_v13 = vadd.f32 %v2938_v9, %v498_v12  ;;  %670 = vmatpush.msrb.mxu0 %v598_v39 }
  0x2d   : > { %927 = vmatpush.msrb.mxu1 %v815_v53  ;;  %700 = vmatpush.msrb.mxu2 %v601_v59  ;;  %v804_v53 = vld [vmem:[#allocation5 + $0x10] sm:$0xff]  ;;  %v608_v59 = vld [vmem:[#allocation2 + $0x80] sm:$0xff] }
  0x2e   : > { %490 = vadd.xlane.f32.xlu0 %v489_v6  ;;  %484 = vadd.xlane.f32.xlu1 %v483_v7  ;;  %v3351_v14 = vsel %vm500_vm1, %v2938_v9, %v499_v13  ;;  %v605_v13 = vld [vmem:[#allocation2 + $0x68] sm:$0xff] }
  0x2f   : > { %671 = vmatpush.msrb.mxu0 %v597_v42  ;;  %928 = vmatpush.msrb.mxu1 %v814_v58 }
  0x30   : > { %701 = vmatpush.msrb.mxu2 %v600_v10 }
  0x31   : > { %672 = vmatpush.msrb.mxu0 %v596_v45 }
  0x99   : > { %v494_v15 = vpop.xlane.xlu1 %493  ;;  %v488_v16 = vpop.xlane.xlu0 %487 }
  0x9a   : > { %v505_v17 = vmul.f32 %v3351_v14, %v494_v15  ;;  %v503_v18 = vmul.f32 %v3351_v14, %v488_v16 }
  0x9c   : > { %v3355_v19 = vsub.f32 %v479_v0, %v505_v17  ;;  %v3357_v20 = vsub.f32 %v477_v1, %v503_v18  ;;  %v607_v0 = vld [vmem:[#allocation2 + $0x78] sm:$0xff] }
  0x9d   : > { %727 = vmatpush.msrb.mxu3 %v607_v0  ;;  %v811_v0 = vld [vmem:[#allocation5 + $0x48] sm:$0xff] }
  0x9e   : > { %v513_v21 = vmul.f32 %v3355_v19, %v3355_v19  ;;  %v511_v22 = vmul.f32 %v3357_v20, %v3357_v20 }
  0x9f   : > { %728 = vmatpush.msrb.mxu3 %v606_v11 }
  0xa0   : > { %v523_v23 = vsel %vm482_vm0, %v513_v21, 0.0  ;;  %v517_v24 = vsel %vm482_vm0, %v511_v22, 0.0  ;;  %v604_v22 = vld [vmem:[#allocation2 + $0x60] sm:$0xff] }
  0xa1   : > { %524 = vadd.xlane.f32.xlu0 %v523_v23  ;;  %518 = vadd.xlane.f32.xlu2 %v517_v24  ;;  %v491_v25 = vpop.xlane.xlu0 %490  ;;  %v485_v26 = vpop.xlane.xlu1 %484  ;;  %v2930_v23 = vld [vmem:[%s4098_s2] ss:$0 sm:$0xff] }
  0xa2   : > { %v504_v27 = vmul.f32 %v3351_v14, %v491_v25  ;;  %v502_v28 = vmul.f32 %v3351_v14, %v485_v26  ;;  %729 = vmatpush.msrb.mxu3 %v605_v13 }
  0xa4   : > { %v3367_v29 = vsub.f32 %v478_v4, %v504_v27  ;;  %v3369_v30 = vsub.f32 %v476_v5, %v502_v28  ;;  %730 = vmatpush.msrb.mxu3 %v604_v22  ;;  %v2931_v27 = vld [vmem:[%s4099_s3] ss:$0 sm:$0xff] }
  0xa6   : > { %v512_v31 = vmul.f32 %v3367_v29, %v3367_v29  ;;  %v510_v32 = vmul.f32 %v3369_v30, %v3369_v30 }
  0xa8   : > { %v520_v33 = vsel %vm482_vm0, %v512_v31, 0.0  ;;  %v514_v34 = vsel %vm482_vm0, %v510_v32, 0.0 }
  0xa9   : > { %521 = vadd.xlane.f32.xlu2 %v520_v33  ;;  %515 = vadd.xlane.f32.xlu1 %v514_v34 }
 0x114   : > { %v519_v48 = vpop.xlane.xlu2 %518  ;;  %v525_v49 = vpop.xlane.xlu0 %524 }
 0x115   : > { %v527_v51 = vmul.f32 %v519_v48, %v3351_v14  ;;  %v529_v52 = vmul.f32 %v525_v49, %v3351_v14 }
 0x117   : > { %v531_v54 = vadd.f32 1e-05, %v527_v51  ;;  %v3379_v55 = vadd.f32 1e-05, %v529_v52  ;;  %v611_v51 = vld [vmem:[#allocation2 + $0x98] sm:$0xff] }
 0x118   : > { %v809_v52 = vld [vmem:[#allocation5 + $0x38] sm:$0xff] }
 0x119   : > { %2939 = vrsqrt.f32 %v531_v54  ;;  %vm550_vm3 = vweird.f32 %v531_v54  ;;  %vm570_vm5 = vweird.f32 %v3379_v55 }
 0x11a   : > { %2941 = vrsqrt.f32 %v3379_v55 }
 0x11c   : > { %v522_v60 = vpop.xlane.xlu2 %521  ;;  %v516_v61 = vpop.xlane.xlu1 %515 }
 0x11d   : > { %v528_v62 = vmul.f32 %v522_v60, %v3351_v14  ;;  %v526_v63 = vmul.f32 %v516_v61, %v3351_v14  ;;  %v813_v60 = vld [vmem:[#allocation5 + $0x58] sm:$0xff]  ;;  %v812_v61 = vld [vmem:[#allocation5 + $0x50] sm:$0xff] }
 0x11f   : > { %v2940_v1 = vpop.eup %2939  ;;  %v532_v2 = vadd.f32 1e-05, %v528_v62  ;;  %v530_v3 = vadd.f32 1e-05, %v526_v63  ;;  %v802_v62 = vld [vmem:[#allocation5] sm:$0xff] }
 0x120   : > { %v2942_v4 = vpop.eup %2941  ;;  %v545_v5 = vmul.f32 %v2940_v1, %v531_v54  ;;  %vm551_vm2 = vweird.f32 %v2940_v1  ;;  %v609_v54 = vld [vmem:[#allocation2 + $0x88] sm:$0xff]  ;;  %v806_v63 = vld [vmem:[#allocation5 + $0x20] sm:$0xff] }
 0x121   : > { %v565_v6 = vmul.f32 %v2942_v4, %v3379_v55  ;;  %2943 = vrsqrt.f32 %v532_v2  ;;  %vm552_vm4 = vmor %vm550_vm3, %vm551_vm2  ;;  %vm540_vm7 = vweird.f32 %v530_v3  ;;  %vm571_vm9 = vweird.f32 %v2942_v4  ;;  %v808_v55 = vld [vmem:[#allocation5 + $0x30] sm:$0xff] }
 0x122   : > { %v546_v7 = vmul.f32 %v2940_v1, %v545_v5  ;;  %2945 = vrsqrt.f32 %v530_v3  ;;  %vm560_vm10 = vweird.f32 %v532_v2  ;;  %vm572_vm13 = vmor %vm570_vm5, %vm571_vm9  ;;  %v824_v5 = vld [vmem:[#allocation5 + $0xb0] sm:$0xff] }
 0x123   : > { %v566_v9 = vmul.f32 %v2942_v4, %v565_v6  ;;  %v819_v6 = vld [vmem:[#allocation5 + $0x88] sm:$0xff] }
 0x124   : > { %v547_v8 = vmul.f32 0.5, %v546_v7  ;;  %v823_v7 = vld [vmem:[#allocation5 + $0xa8] sm:$0xff] }
 0x125   : > { %v567_v18 = vmul.f32 0.5, %v566_v9  ;;  %v822_v9 = vld [vmem:[#allocation5 + $0xa0] sm:$0xff] }
 0x126   : > { %v548_v12 = vsub.f32 1.5, %v547_v8  ;;  %v818_v8 = vld [vmem:[#allocation5 + $0x80] sm:$0xff] }
 0x127   : > { %v2944_v15 = vpop.eup %2943  ;;  %v568_v32 = vsub.f32 1.5, %v567_v18 }
 0x128   : > { %v2946_v16 = vpop.eup %2945  ;;  %v549_v17 = vmul.f32 %v2940_v1, %v548_v12  ;;  %v555_v21 = vmul.f32 %v2944_v15, %v532_v2  ;;  %vm561_vm6 = vweird.f32 %v2944_v15  ;;  %v821_v2 = vld [vmem:[#allocation5 + $0x98] sm:$0xff] }
 0x129   : > { %v535_v24 = vmul.f32 %v2946_v16, %v530_v3  ;;  %vm541_vm8 = vweird.f32 %v2946_v16  ;;  %v569_v39 = vmul.f32 %v2942_v4, %v568_v32  ;;  %vm562_vm11 = vmor %vm560_vm10, %vm561_vm6  ;;  %v825_v3 = vld [vmem:[#allocation5 + $0xb8] sm:$0xff] }
 0x12a   : > { %v553_v25 = vsel %vm552_vm4, %v2940_v1, %v549_v17  ;;  %v556_v26 = vmul.f32 %v2944_v15, %v555_v21  ;;  %vm542_vm12 = vmor %vm540_vm7, %vm541_vm8  ;;  %v810_v1 = vld [vmem:[#allocation5 + $0x40] sm:$0xff] }
 0x12b   : > { %v575_v28 = vmul.f32 %v553_v25, %v3357_v20  ;;  %v536_v31 = vmul.f32 %v2946_v16, %v535_v24  ;;  %v573_v44 = vsel %vm572_vm13, %v2942_v4, %v569_v39  ;;  %v820_v4 = vld [vmem:[#allocation5 + $0x90] sm:$0xff] }
 0x12c   : > { %v557_v33 = vmul.f32 0.5, %v556_v26  ;;  %v577_v48 = vmul.f32 %v573_v44, %v3355_v19  ;;  %v805_v19 = vld [vmem:[#allocation5 + $0x18] sm:$0xff] }
 0x12d   : > { %v582_v34 = vmul.f32 %v2930_v23, %v575_v28  ;;  %v537_v35 = vmul.f32 0.5, %v536_v31 }
 0x12e   : > { %v558_v36 = vsub.f32 1.5, %v557_v33 }
 0x12f   : > { %v3393_v37 = vadd.f32 %v2931_v27, %v582_v34  ;;  %v538_v38 = vsub.f32 1.5, %v537_v35 }
 0x130   : > { %v559_v40 = vmul.f32 %v2944_v15, %v558_v36 }
 0x131   : > { %v539_v20 = vmul.f32 %v2946_v16, %v538_v38  ;;  %2728 = vmatmul.msk.f32.vlgmr.msra.gmra.mxu3 %vm482_vm0, %v3393_v37  ;;  %2732 = vmatmul.msk.f32.vlgmr.msra.gmra.mxu2 %vm482_vm0, %v3393_v37 }
 0x132   : > { %v563_v41 = vsel %vm562_vm11, %v2944_v15, %v559_v40  ;;  %838 = vmatpush.msra.mxu2 %v805_v19  ;;  %867 = vmatpush.msra.mxu3 %v809_v52 }
 0x133   : > { %v576_v42 = vmul.f32 %v563_v41, %v3367_v29  ;;  %v543_v43 = vsel %vm542_vm12, %v2946_v16, %v539_v20  ;;  %v610_v29 = vld [vmem:[#allocation2 + $0x90] sm:$0xff] }
 0x134   : > { %v574_v45 = vmul.f32 %v543_v43, %v3369_v30  ;;  %v584_v30 = vmul.f32 %v2930_v23, %v577_v48  ;;  %839 = vmatpush.msra.mxu2 %v804_v53  ;;  %868 = vmatpush.msra.mxu3 %v808_v55 }
 0x135   : > { %v583_v46 = vmul.f32 %v2930_v23, %v576_v42 }
 0x136   : > { %v581_v47 = vmul.f32 %v2930_v23, %v574_v45  ;;  %v3418_v58 = vadd.f32 %v2931_v27, %v584_v30  ;;  %840 = vmatpush.msra.mxu2 %v803_v56  ;;  %869 = vmatpush.msra.mxu3 %v807_v57  ;;  %v3603_v56 = vld [vmem:[%s4097_s1] sm:$0xff] }
 0x137   : > { %v3404_v49 = vadd.f32 %v2931_v27, %v583_v46 }
 0x138   : > { %v3406_v50 = vadd.f32 %v2931_v27, %v581_v47  ;;  %841 = vmatpush.msra.mxu2 %v802_v62  ;;  %870 = vmatpush.msra.mxu3 %v806_v63 }
 0x139   : > { %2729 = vmatmul.msk.f32.gmra.mxu3 %vm482_vm0, %v3404_v49  ;;  %2733 = vmatmul.msk.f32.gmra.mxu2 %vm482_vm0, %v3404_v49 }
 0x13a   : > { %2727 = vmatmul.msk.f32.vlgmr.msra.gmra.mxu0 %vm482_vm0, %v3406_v50  ;;  %2747 = vmatmul.msk.f32.vlgmr.msra.gmra.mxu1 %vm482_vm0, %v3406_v50 }
 0x13b   : > { %2777 = vmatpush.xpose.msk.msra.mxu1 %vm482_vm0, %v3393_v37  ;;  %756 = vmatpush.msra.mxu0 %v611_v51 }
 0x13d   : > { %757 = vmatpush.msra.mxu0 %v610_v29 }
 0x13f   : > { %758 = vmatpush.msra.mxu0 %v609_v54 }
 0x141   : > { %2730 = vmatmul.msk.f32.gmra.mxu3 %vm482_vm0, %v3418_v58  ;;  %2734 = vmatmul.msk.f32.gmra.mxu2 %vm482_vm0, %v3418_v58 }
 0x142   : > { %2731 = vmatmul.msk.f32.vlgmr.msrb.gmra.mxu0 %vm482_vm0, %v3406_v50  ;;  %2748 = vmatmul.msk.f32.gmra.mxu1 %vm482_vm0, %v3393_v37 }
 0x143   : > { %759 = vmatpush.msra.mxu0 %v608_v59 }
 0x145   : > { %896 = vmatpush.msrb.mxu0 %v813_v60 }
 0x147   : > { %897 = vmatpush.msrb.mxu0 %v812_v61 }
 0x149   : > { %898 = vmatpush.msrb.mxu0 %v811_v0  ;;  %2735 = vmatmul.msk.f32.vlgmr.msrb.gmra.mxu2 %vm482_vm0, %v3406_v50 }
 0x14a   : > { %2739 = vmatmul.msk.f32.vlgmr.msrb.gmra.mxu3 %vm482_vm0, %v3406_v50  ;;  %2749 = vmatmul.msk.f32.gmra.mxu1 %vm482_vm0, %v3404_v49 }
 0x14b   : > { %899 = vmatpush.msrb.mxu0 %v810_v1  ;;  %954 = vmatpush.msrb.mxu2 %v821_v2 }
 0x14c   : > { %2743 = vmatmul.msk.f32.vlgmr.msra.gmra.mxu0 %vm482_vm0, %v3406_v50  ;;  %983 = vmatpush.msrb.mxu3 %v825_v3 }
 0x14d   : > { %2775 = vmatpush.xpose.msk.msra.mxu0 %vm482_vm0, %v3406_v50  ;;  %955 = vmatpush.msrb.mxu2 %v820_v4 }
 0x14e   : > { %984 = vmatpush.msrb.mxu3 %v824_v5 }
 0x14f   : > { %956 = vmatpush.msrb.mxu2 %v819_v6 }
 0x150   : > { %985 = vmatpush.msrb.mxu3 %v823_v7 }
 0x151   : > { %2736 = vmatmul.msk.f32.gmra.mxu2 %vm482_vm0, %v3393_v37 }
 0x152   : > { %2740 = vmatmul.msk.f32.gmra.mxu3 %vm482_vm0, %v3393_v37  ;;  %2750 = vmatmul.msk.f32.gmra.mxu1 %vm482_vm0, %v3418_v58 }
 0x153   : > { %957 = vmatpush.msrb.mxu2 %v818_v8  ;;  %986 = vmatpush.msrb.mxu3 %v822_v9 }
 0x154   : > { %2744 = vmatmul.msk.f32.gmra.mxu0 %vm482_vm0, %v3393_v37 }
 0x159   : > { %2737 = vmatmul.msk.f32.gmra.mxu2 %vm482_vm0, %v3404_v49 }
 0x15a   : > { %2741 = vmatmul.msk.f32.gmra.mxu3 %vm482_vm0, %v3404_v49  ;;  %2763 = vmatmul.msk.f32.vlgmr.msrb.gmra.mxu1 %vm482_vm0, %v3406_v50 }
 0x15b   : > { %2785 = vmatpush.xpose.msk.msrb.mxu1 %vm482_vm0, %v3393_v37 }
 0x15c   : > { %2745 = vmatmul.msk.f32.gmra.mxu0 %vm482_vm0, %v3404_v49 }
 0x161   : > { %2738 = vmatmul.msk.f32.gmra.mxu2 %vm482_vm0, %v3418_v58 }
 0x162   : > { %2742 = vmatmul.msk.f32.gmra.mxu3 %vm482_vm0, %v3418_v58  ;;  %2764 = vmatmul.msk.f32.gmra.mxu1 %vm482_vm0, %v3393_v37 }
 0x164   : > { %2746 = vmatmul.msk.f32.gmra.mxu0 %vm482_vm0, %v3418_v58 }
 0x169   : > { %2751 = vmatmul.msk.f32.vlgmr.msra.gmra.mxu2 %vm482_vm0, %v3406_v50 }
 0x16a   : > { %2755 = vmatmul.msk.f32.vlgmr.msra.gmra.mxu3 %vm482_vm0, %v3406_v50  ;;  %2765 = vmatmul.msk.f32.gmra.mxu1 %vm482_vm0, %v3404_v49 }
 0x16b   : > { %2779 = vmatpush.xpose.msk.msra.mxu2 %vm482_vm0, %v3404_v49  ;;  %2781 = vmatpush.xpose.msk.msra.mxu3 %vm482_vm0, %v3418_v58 }
 0x16c   : > { %2759 = vmatmul.msk.f32.vlgmr.msrb.gmra.mxu0 %vm482_vm0, %v3406_v50 }
 0x16d   : > { %2783 = vmatpush.xpose.msk.msrb.mxu0 %vm482_vm0, %v3406_v50 }
 0x171   : > { %2752 = vmatmul.msk.f32.gmra.mxu2 %vm482_vm0, %v3393_v37 }
 0x172   : > { %2756 = vmatmul.msk.f32.gmra.mxu3 %vm482_vm0, %v3393_v37  ;;  %2766 = vmatmul.msk.f32.gmra.mxu1 %vm482_vm0, %v3418_v58 }
 0x174   : > { %2760 = vmatmul.msk.f32.gmra.mxu0 %vm482_vm0, %v3393_v37 }
 0x179   : > { %2753 = vmatmul.msk.f32.gmra.mxu2 %vm482_vm0, %v3404_v49 }
 0x17a   : > { %2757 = vmatmul.msk.f32.gmra.mxu3 %vm482_vm0, %v3404_v49 }
 0x17c   : > { %2761 = vmatmul.msk.f32.gmra.mxu0 %vm482_vm0, %v3404_v49 }
 0x181   : > { %2754 = vmatmul.msk.f32.gmra.mxu2 %vm482_vm0, %v3418_v58 }
 0x182   : > { %2758 = vmatmul.msk.f32.gmra.mxu3 %vm482_vm0, %v3418_v58 }
 0x184   : > { %2762 = vmatmul.msk.f32.gmra.mxu0 %vm482_vm0, %v3418_v58 }
 0x189   : > { %2767 = vmatmul.msk.f32.vlgmr.msrb.gmra.mxu2 %vm482_vm0, %v3406_v50 }
 0x18a   : > { %2771 = vmatmul.msk.f32.vlgmr.msrb.gmra.mxu3 %vm482_vm0, %v3406_v50  ;;  %2787 = vmatpush.xpose.msk.msrb.mxu2 %vm482_vm0, %v3404_v49 }
 0x18b   : > { %2789 = vmatpush.xpose.msk.msrb.mxu3 %vm482_vm0, %v3418_v58 }
 0x191   : > { %2768 = vmatmul.msk.f32.gmra.mxu2 %vm482_vm0, %v3393_v37 }
 0x192   : > { %2772 = vmatmul.msk.f32.gmra.mxu3 %vm482_vm0, %v3393_v37 }
 0x199   : > { %2769 = vmatmul.msk.f32.gmra.mxu2 %vm482_vm0, %v3404_v49 }
 0x19a   : > { %2773 = vmatmul.msk.f32.gmra.mxu3 %vm482_vm0, %v3404_v49 }
 0x1a1   : > { %2770 = vmatmul.msk.f32.gmra.mxu2 %vm482_vm0, %v3418_v58 }
 0x1a2   : > { %2774 = vmatmul.msk.f32.gmra.mxu3 %vm482_vm0, %v3418_v58 }
 0x1b4   : > { %v648_v10 = vpop.f32.mrf.mxu3  ;;  %v677_v11 = vpop.f32.mrf.mxu2 }
 0x1b5   : > { %2778 = vmatmul.msk.f32.vlgmr.msra.gmra.mxu1 %vm482_vm0, %v648_v10 }
 0x1b6   : > { %2793 = vmatpush.xpose.msk.msra.mxu1 %vm482_vm0, %v3393_v37 }
 0x1b7   : > { %v645_v12 = vpop.f32.mrf.mxu0  ;;  %v790_v28 = vpop.f32.mrf.mxu1 }
 0x1b8   : > { %2776 = vmatmul.msk.f32.vlgmr.msra.gmra.mxu0 %vm482_vm0, %v645_v12 }
 0x1b9   : > { %2791 = vmatpush.xpose.msk.msra.mxu0 %vm482_vm0, %v3406_v50 }
 0x1bc   : > { %v651_v13 = vpop.f32.mrf.mxu3  ;;  %v680_v15 = vpop.f32.mrf.mxu2 }
 0x1bd   : > { %2780 = vmatmul.msk.f32.vlgmr.msra.gmra.mxu2 %vm482_vm0, %v651_v13  ;;  %2786 = vmatmul.msk.f32.vlgmr.msrb.gmra.mxu1 %vm482_vm0, %v677_v11 }
 0x1be   : > { %2795 = vmatpush.xpose.msk.msra.mxu2 %vm482_vm0, %v3404_v49  ;;  %2801 = vmatpush.xpose.msk.msrb.mxu1 %vm482_vm0, %v3393_v37 }
 0x1bf   : > { %v674_v16 = vpop.f32.mrf.mxu0  ;;  %v793_v34 = vpop.f32.mrf.mxu1 }
 0x1c0   : > { %2784 = vmatmul.msk.f32.vlgmr.msrb.gmra.mxu0 %vm482_vm0, %v674_v16 }
 0x1c1   : > { %2799 = vmatpush.xpose.msk.msrb.mxu0 %vm482_vm0, %v3406_v50 }
 0x1c4   : > { %v654_v17 = vpop.f32.mrf.mxu3  ;;  %v683_v18 = vpop.f32.mrf.mxu2 }
 0x1c5   : > { %2782 = vmatmul.msk.f32.vlgmr.msra.gmra.mxu3 %vm482_vm0, %v654_v17  ;;  %2788 = vmatmul.msk.f32.vlgmr.msrb.gmra.mxu2 %vm482_vm0, %v680_v15 }
 0x1c6   : > { %2797 = vmatpush.xpose.msk.msra.mxu3 %vm482_vm0, %v3418_v58  ;;  %2803 = vmatpush.xpose.msk.msrb.mxu2 %vm482_vm0, %v3404_v49 }
 0x1c7   : > { %v796_v38 = vpop.f32.mrf.mxu1 }
 0x1c9   : > { %v761_v25 = vpop.f32.mrf.mxu0 }
 0x1cc   : > { %v703_v21 = vpop.f32.mrf.mxu2 }
 0x1cd   : > { %v732_v22 = vpop.f32.mrf.mxu3  ;;  %2790 = vmatmul.msk.f32.vlgmr.msrb.gmra.mxu3 %vm482_vm0, %v683_v18  ;;  %2792 = vmatmul.msk.f32.vlgmr.msra.gmra.mxu0 %vm482_vm0, %v703_v21 }
 0x1ce   : > { %2805 = vmatpush.xpose.msk.msrb.mxu3 %vm482_vm0, %v3418_v58  ;;  %2807 = vmatpush.xpose.msk.msra.mxu0 %vm482_vm0, %v3406_v50 }
 0x1cf   : > { %v799_v41 = vpop.f32.mrf.mxu1 }
 0x1d1   : > { %v764_v31 = vpop.f32.mrf.mxu0 }
 0x1d4   : > { %v706_v23 = vpop.f32.mrf.mxu2 }
 0x1d5   : > { %v735_v24 = vpop.f32.mrf.mxu3  ;;  %2794 = vmatmul.msk.f32.vlgmr.msra.gmra.mxu1 %vm482_vm0, %v706_v23  ;;  %2800 = vmatmul.msk.f32.vlgmr.msrb.gmra.mxu0 %vm482_vm0, %v732_v22 }
 0x1d6   : > { %2809 = vmatpush.xpose.msk.msra.mxu1 %vm482_vm0, %v3393_v37  ;;  %2815 = vmatpush.xpose.msk.msrb.mxu0 %vm482_vm0, %v3406_v50 }
 0x1d7   : > { %v3574_v46 = vpop.f32.mrf.mxu1 }
 0x1d9   : > { %v767_v35 = vpop.f32.mrf.mxu0 }
 0x1dc   : > { %v709_v26 = vpop.f32.mrf.mxu2 }
 0x1dd   : > { %v738_v27 = vpop.f32.mrf.mxu3  ;;  %2796 = vmatmul.msk.f32.vlgmr.msra.gmra.mxu2 %vm482_vm0, %v709_v26  ;;  %2802 = vmatmul.msk.f32.vlgmr.msrb.gmra.mxu1 %vm482_vm0, %v735_v24 }
 0x1de   : > { %2808 = vmatmul.msk.f32.vlgmr.msra.gmra.mxu0 %vm482_vm0, %v761_v25  ;;  %2811 = vmatpush.xpose.msk.msra.mxu2 %vm482_vm0, %v3404_v49 }
 0x1df   : > { %2817 = vmatpush.xpose.msk.msrb.mxu1 %vm482_vm0, %v3393_v37  ;;  %v3578_v48 = vpop.f32.mrf.mxu1 }
 0x1e1   : > { %v770_v39 = vpop.f32.mrf.mxu0 }
 0x1e4   : > { %v712_v32 = vpop.f32.mrf.mxu2 }
 0x1e5   : > { %v741_v33 = vpop.f32.mrf.mxu3  ;;  %2798 = vmatmul.msk.f32.vlgmr.msra.gmra.mxu3 %vm482_vm0, %v712_v32  ;;  %2804 = vmatmul.msk.f32.vlgmr.msrb.gmra.mxu2 %vm482_vm0, %v738_v27 }
 0x1e6   : > { %2810 = vmatmul.msk.f32.vlgmr.msra.gmra.mxu1 %vm482_vm0, %v764_v31  ;;  %2813 = vmatpush.xpose.msk.msra.mxu3 %vm482_vm0, %v3418_v58 }
 0x1e7   : > { %2816 = vmatmul.msk.f32.vlgmr.msrb.gmra.mxu0 %vm482_vm0, %v790_v28  ;;  %2819 = vmatpush.xpose.msk.msrb.mxu2 %vm482_vm0, %v3404_v49  ;;  %v3584_v51 = vpop.f32.mrf.mxu1 }
 0x1e9   : > { %v3576_v47 = vpop.f32.mrf.mxu0 }
 0x1ec   : > { %v843_v36 = vpop.f32.mrf.mxu2 }
 0x1ed   : > { %v872_v37 = vpop.f32.mrf.mxu3  ;;  %2806 = vmatmul.msk.f32.vlgmr.msrb.gmra.mxu3 %vm482_vm0, %v741_v33  ;;  %2812 = vmatmul.msk.f32.vlgmr.msra.gmra.mxu2 %vm482_vm0, %v767_v35 }
 0x1ee   : > { %2818 = vmatmul.msk.f32.vlgmr.msrb.gmra.mxu1 %vm482_vm0, %v793_v34  ;;  %2821 = vmatpush.xpose.msk.msrb.mxu3 %vm482_vm0, %v3418_v58 }
 0x1ef   : > { %1836 = vmatpush.msra.mxu0 %v843_v36  ;;  %v3592_v52 = vpop.f32.mrf.mxu1 }
 0x1f1   : > { %1928 = vmatpush.msrb.mxu0 %v872_v37  ;;  %v3580_v49 = vpop.f32.mrf.mxu0 }
 0x1f4   : > { %v846_v40 = vpop.f32.mrf.mxu2 }
 0x1f5   : > { %v875_v20 = vpop.f32.mrf.mxu3  ;;  %2814 = vmatmul.msk.f32.vlgmr.msra.gmra.mxu3 %vm482_vm0, %v770_v39  ;;  %2820 = vmatmul.msk.f32.vlgmr.msrb.gmra.mxu2 %vm482_vm0, %v796_v38 }
 0x1f6   : > { %1859 = vmatpush.msra.mxu1 %v846_v40 }
 0x1f8   : > { %1951 = vmatpush.msrb.mxu1 %v875_v20 }
 0x1f9   : > { %v3588_v30 = vpop.f32.mrf.mxu0 }
 0x1fc   : > { %v849_v42 = vpop.f32.mrf.mxu2 }
 0x1fd   : > { %v878_v43 = vpop.f32.mrf.mxu3  ;;  %2822 = vmatmul.msk.f32.vlgmr.msrb.gmra.mxu3 %vm482_vm0, %v799_v41  ;;  %1882 = vmatpush.msra.mxu2 %v849_v42 }
 0x1ff   : > { %1974 = vmatpush.msrb.mxu2 %v878_v43 }
 0x201   : > { %v3596_v54 = vpop.f32.mrf.mxu0 }
 0x204   : > { %v852_v44 = vpop.f32.mrf.mxu2 }
 0x205   : > { %v881_v45 = vpop.f32.mrf.mxu3  ;;  %1905 = vmatpush.msra.mxu3 %v852_v44 }
 0x207   : > { %1997 = vmatpush.msrb.mxu3 %v881_v45 }
 0x20c   : > { %v3582_v50 = vpop.f32.mrf.mxu2 }
 0x20d   : > { %v3586_v29 = vpop.f32.mrf.mxu3 }
 0x214   : > { %v3590_v19 = vpop.f32.mrf.mxu2 }
 0x215   : > { %v3594_v53 = vpop.f32.mrf.mxu3 }
 0x21c   : > { %v3598_v55 = vpop.f32.mrf.mxu2 }
 0x21d   : > { %v3610_v61 = vpop.f32.mrf.mxu3 }
 0x224   : > { %v3615_v63 = vpop.f32.mrf.mxu2 }
 0x225   : > { %v3627_v6 = vpop.f32.mrf.mxu3 }
 0x232   : > { %v1044_v57 = vpop.f32.mrf.mxu1 }
 0x233   : > { %v3606_v58 = vadd.f32 %v1044_v57, %v3603_v56 }
 0x235   : > { %v1021_v59 = vpop.f32.mrf.mxu0  ;;  %v1557_v60 = vsel %vm1553_vm14, %v3606_v58, -inf }
 0x236   : > { %v3613_v62 = vadd.f32 %v1021_v59, %v3603_v56  ;;  %1558 = vmax.xlane.f32.xlu0 %v1557_v60 }
 0x238   : > { %v1554_v0 = vsel %vm1553_vm14, %v3613_v62, -inf }
 0x239   : > { %1555 = vmax.xlane.f32.xlu2 %v1554_v0 }
 0x23a   : > { %v1136_v1 = vpop.f32.mrf.mxu1 }
 0x23b   : > { %v3620_v2 = vadd.f32 %v1136_v1, %v3603_v56 }
 0x23d   : > { %v1113_v3 = vpop.f32.mrf.mxu0  ;;  %v1569_v4 = vsel %vm1553_vm14, %v3620_v2, -inf }
 0x23e   : > { %v3625_v5 = vadd.f32 %v1113_v3, %v3603_v56  ;;  %1570 = vmax.xlane.f32.xlu0 %v1569_v4 }
 0x240   : > { %v1067_v7 = vpop.f32.mrf.mxu2  ;;  %v1566_v8 = vsel %vm1553_vm14, %v3625_v5, -inf }
 0x241   : > { %v3632_v9 = vadd.f32 %v1067_v7, %v3603_v56  ;;  %1567 = vmax.xlane.f32.xlu1 %v1566_v8 }
 0x243   : > { %v1560_v10 = vsel %vm1553_vm14, %v3632_v9, -inf }
 0x244   : > { %1561 = vmax.xlane.f32.xlu2 %v1560_v10 }
 0x248   : > { %v1090_v11 = vpop.f32.mrf.mxu3  ;;  %v1159_v12 = vpop.f32.mrf.mxu2 }
 0x249   : > { %v3637_v13 = vadd.f32 %v1090_v11, %v3603_v56  ;;  %v3640_v15 = vadd.f32 %v1159_v12, %v3603_v56 }
 0x24a   : > { %v1205_v16 = vpop.f32.mrf.mxu0 }
 0x24b   : > { %v3643_v17 = vadd.f32 %v1205_v16, %v3603_v56  ;;  %v1572_v18 = vsel %vm1553_vm14, %v3640_v15, -inf  ;;  %v1563_v21 = vsel %vm1553_vm14, %v3637_v13, -inf }
 0x24c   : > { %1573 = vmax.xlane.f32.xlu0 %v1572_v18  ;;  %1564 = vmax.xlane.f32.xlu2 %v1563_v21 }
 0x24d   : > { %v1578_v22 = vsel %vm1553_vm14, %v3643_v17, -inf }
 0x24e   : > { %1579 = vmax.xlane.f32.xlu1 %v1578_v22 }
 0x250   : > { %v1182_v23 = vpop.f32.mrf.mxu3 }
 0x251   : > { %v3652_v24 = vadd.f32 %v1182_v23, %v3603_v56 }
 0x252   : > { %v1228_v25 = vpop.f32.mrf.mxu1  ;;  %v1297_v26 = vpop.f32.mrf.mxu0 }
 0x253   : > { %v3655_v27 = vadd.f32 %v1228_v25, %v3603_v56  ;;  %v3658_v28 = vadd.f32 %v1297_v26, %v3603_v56  ;;  %v1575_v31 = vsel %vm1553_vm14, %v3652_v24, -inf }
 0x254   : > { %1576 = vmax.xlane.f32.xlu0 %v1575_v31 }
 0x255   : > { %v1581_v32 = vsel %vm1553_vm14, %v3655_v27, -inf  ;;  %v1590_v33 = vsel %vm1553_vm14, %v3658_v28, -inf }
 0x256   : > { %1582 = vmax.xlane.f32.xlu1 %v1581_v32  ;;  %1591 = vmax.xlane.f32.xlu2 %v1590_v33 }
 0x25a   : > { %v1320_v34 = vpop.f32.mrf.mxu1 }
 0x25b   : > { %v3667_v35 = vadd.f32 %v1320_v34, %v3603_v56  ;;  %v1389_v36 = vpop.f32.mrf.mxu0 }
 0x25c   : > { %v3670_v37 = vadd.f32 %v1389_v36, %v3603_v56 }
 0x25d   : > { %v1593_v38 = vsel %vm1553_vm14, %v3667_v35, -inf }
 0x25e   : > { %v1602_v39 = vsel %vm1553_vm14, %v3670_v37, -inf  ;;  %1594 = vmax.xlane.f32.xlu2 %v1593_v38 }
 0x25f   : > { %1603 = vmax.xlane.f32.xlu0 %v1602_v39 }
 0x260   : > { %v1251_v40 = vpop.f32.mrf.mxu2 }
 0x261   : > { %v3677_v20 = vadd.f32 %v1251_v40, %v3603_v56 }
 0x263   : > { %v1412_v41 = vpop.f32.mrf.mxu1  ;;  %v1584_v42 = vsel %vm1553_vm14, %v3677_v20, -inf }
 0x264   : > { %v3682_v43 = vadd.f32 %v1412_v41, %v3603_v56  ;;  %v1481_v44 = vpop.f32.mrf.mxu0  ;;  %1585 = vmax.xlane.f32.xlu1 %v1584_v42 }
 0x265   : > { %v3687_v57 = vadd.f32 %v1481_v44, %v3603_v56 }
 0x266   : > { %v1605_v45 = vsel %vm1553_vm14, %v3682_v43, -inf }
 0x267   : > { %1606 = vmax.xlane.f32.xlu0 %v1605_v45  ;;  %v1614_v1 = vsel %vm1553_vm14, %v3687_v57, -inf }
 0x268   : > { %v1274_v59 = vpop.f32.mrf.mxu3  ;;  %v1343_v60 = vpop.f32.mrf.mxu2 }
 0x269   : > { %v3690_v0 = vadd.f32 %v1343_v60, %v3603_v56  ;;  %v3697_v4 = vadd.f32 %v1274_v59, %v3603_v56 }
 0x26b   : > { %v1596_v3 = vsel %vm1553_vm14, %v3690_v0, -inf  ;;  %v1587_v16 = vsel %vm1553_vm14, %v3697_v4, -inf  ;;  %v1504_v21 = vpop.f32.mrf.mxu1 }
 0x26c   : > { %1615 = vmax.xlane.f32.xlu1 %v1614_v1  ;;  %1597 = vmax.xlane.f32.xlu2 %v1596_v3  ;;  %v3712_v22 = vadd.f32 %v1504_v21, %v3603_v56 }
 0x26e   : > { %v1617_v33 = vsel %vm1553_vm14, %v3712_v22, -inf }
 0x270   : > { %v1366_v7 = vpop.f32.mrf.mxu3  ;;  %v1435_v8 = vpop.f32.mrf.mxu2 }
 0x271   : > { %v3700_v10 = vadd.f32 %v1366_v7, %v3603_v56  ;;  %v3703_v11 = vadd.f32 %v1435_v8, %v3603_v56 }
 0x273   : > { %v1608_v12 = vsel %vm1553_vm14, %v3703_v11, -inf  ;;  %v1599_v18 = vsel %vm1553_vm14, %v3700_v10, -inf }
 0x274   : > { %1609 = vmax.xlane.f32.xlu0 %v1608_v12  ;;  %1588 = vmax.xlane.f32.xlu1 %v1587_v16 }
 0x275   : > { %1600 = vmax.xlane.f32.xlu2 %v1599_v18 }
 0x278   : > { %v1458_v23 = vpop.f32.mrf.mxu3  ;;  %v1527_v25 = vpop.f32.mrf.mxu2 }
 0x279   : > { %v3715_v26 = vadd.f32 %v1458_v23, %v3603_v56  ;;  %v3718_v31 = vadd.f32 %v1527_v25, %v3603_v56 }
 0x27b   : > { %v1620_v32 = vsel %vm1553_vm14, %v3718_v31, -inf  ;;  %v1611_v34 = vsel %vm1553_vm14, %v3715_v26, -inf }
 0x27c   : > { %1621 = vmax.xlane.f32.xlu0 %v1620_v32  ;;  %1618 = vmax.xlane.f32.xlu1 %v1617_v33 }
 0x27d   : > { %1612 = vmax.xlane.f32.xlu2 %v1611_v34 }
 0x280   : > { %v1550_v36 = vpop.f32.mrf.mxu3 }
 0x281   : > { %v3727_v38 = vadd.f32 %v1550_v36, %v3603_v56 }
 0x283   : > { %v1623_v39 = vsel %vm1553_vm14, %v3727_v38, -inf }
 0x285   : > { %1624 = vmax.xlane.f32.xlu2 %v1623_v39 }
 0x2a9   : > { %v1559_v40 = vpop.xlane.xlu0 %1558 }
 0x2aa   : > { %v1627_v41 = vsub.f32 %v3606_v58, %v1559_v40 }
 0x2ac   : > { %v1652_v42 = vmul.f32 1.442695, %v1627_v41  ;;  %v1556_v44 = vpop.xlane.xlu2 %1555 }
 0x2ad   : > { %v1626_v45 = vsub.f32 %v3613_v62, %v1556_v44 }
 0x2ae   : > { %2947 = vpow2.f32 %v1652_v42 }
 0x2af   : > { %v1650_v59 = vmul.f32 1.442695, %v1626_v45 }
 0x2b1   : > { %2949 = vpow2.f32 %v1650_v59  ;;  %v1571_v60 = vpop.xlane.xlu0 %1570 }
 0x2b2   : > { %v1631_v1 = vsub.f32 %v3620_v2, %v1571_v60 }
 0x2b4   : > { %v3734_v3 = vpop.eup %2947  ;;  %v1660_v56 = vmul.f32 1.442695, %v1631_v1  ;;  %v1568_v7 = vpop.xlane.xlu1 %1567 }
 0x2b5   : > { %v1630_v8 = vsub.f32 %v3625_v5, %v1568_v7  ;;  %v1701_v12 = vsel %vm1553_vm14, %v3734_v3, 0.0 }
 0x2b6   : > { %2951 = vpow2.f32 %v1660_v56  ;;  %1702 = vadd.xlane.f32.xlu0 %v1701_v12 }
 0x2b7   : > { %v3739_v58 = vpop.eup %2949  ;;  %v1658_v62 = vmul.f32 1.442695, %v1630_v8  ;;  %v1562_v16 = vpop.xlane.xlu2 %1561 }
 0x2b8   : > { %v1628_v18 = vsub.f32 %v3632_v9, %v1562_v16  ;;  %v1698_v2 = vsel %vm1553_vm14, %v3739_v58, 0.0 }
 0x2b9   : > { %2953 = vpow2.f32 %v1658_v62  ;;  %1699 = vadd.xlane.f32.xlu1 %v1698_v2 }
 0x2ba   : > { %v1654_v21 = vmul.f32 1.442695, %v1628_v18 }
 0x2bc   : > { %v3744_v23 = vpop.eup %2951  ;;  %2955 = vpow2.f32 %v1654_v21 }
 0x2bd   : > { %v1713_v5 = vsel %vm1553_vm14, %v3744_v23, 0.0 }
 0x2be   : > { %1714 = vadd.xlane.f32.xlu0 %v1713_v5 }
 0x2bf   : > { %v3748_v25 = vpop.eup %2953  ;;  %v1574_v32 = vpop.xlane.xlu0 %1573 }
 0x2c0   : > { %v1565_v33 = vpop.xlane.xlu2 %1564  ;;  %v1632_v34 = vsub.f32 %v3640_v15, %v1574_v32  ;;  %v1710_v36 = vsel %vm1553_vm14, %v3748_v25, 0.0 }
 0x2c1   : > { %v1629_v9 = vsub.f32 %v3637_v13, %v1565_v33  ;;  %1711 = vadd.xlane.f32.xlu1 %v1710_v36  ;;  %v1580_v39 = vpop.xlane.xlu1 %1579 }
 0x2c2   : > { %v3754_v40 = vpop.eup %2955  ;;  %v1662_v41 = vmul.f32 1.442695, %v1632_v34  ;;  %v1634_v44 = vsub.f32 %v3643_v17, %v1580_v39 }
 0x2c3   : > { %v1656_v42 = vmul.f32 1.442695, %v1629_v9  ;;  %v1704_v45 = vsel %vm1553_vm14, %v3754_v40, 0.0 }
 0x2c4   : > { %2957 = vpow2.f32 %v1662_v41  ;;  %v1666_v59 = vmul.f32 1.442695, %v1634_v44  ;;  %1705 = vadd.xlane.f32.xlu2 %v1704_v45 }
 0x2c5   : > { %2959 = vpow2.f32 %v1656_v42 }
 0x2c6   : > { %2961 = vpow2.f32 %v1666_v59 }
 0x2c7   : > { %v1577_v13 = vpop.xlane.xlu0 %1576 }
 0x2c8   : > { %v1633_v15 = vsub.f32 %v3652_v24, %v1577_v13 }
 0x2c9   : > { %v1583_v60 = vpop.xlane.xlu1 %1582  ;;  %v1592_v1 = vpop.xlane.xlu2 %1591 }
 0x2ca   : > { %v3760_v56 = vpop.eup %2957  ;;  %v1664_v7 = vmul.f32 1.442695, %v1633_v15  ;;  %v1635_v8 = vsub.f32 %v3655_v27, %v1583_v60  ;;  %v1638_v17 = vsub.f32 %v3658_v28, %v1592_v1 }
 0x2cb   : > { %v3764_v12 = vpop.eup %2959  ;;  %v1716_v62 = vsel %vm1553_vm14, %v3760_v56, 0.0 }
 0x2cc   : > { %v3768_v16 = vpop.eup %2961  ;;  %2963 = vpow2.f32 %v1664_v7  ;;  %v1668_v18 = vmul.f32 1.442695, %v1635_v8  ;;  %v1674_v2 = vmul.f32 1.442695, %v1638_v17  ;;  %1717 = vadd.xlane.f32.xlu0 %v1716_v62  ;;  %v1707_v24 = vsel %vm1553_vm14, %v3764_v12, 0.0 }
 0x2cd   : > { %1708 = vadd.xlane.f32.xlu2 %v1707_v24  ;;  %v1722_v27 = vsel %vm1553_vm14, %v3768_v16, 0.0 }
 0x2ce   : > { %2965 = vpow2.f32 %v1668_v18  ;;  %1723 = vadd.xlane.f32.xlu1 %v1722_v27 }
 0x2cf   : > { %2967 = vpow2.f32 %v1674_v2 }
 0x2d1   : > { %v1595_v28 = vpop.xlane.xlu2 %1594 }
 0x2d2   : > { %v3774_v21 = vpop.eup %2963  ;;  %v1604_v5 = vpop.xlane.xlu0 %1603  ;;  %v1639_v32 = vsub.f32 %v3667_v35, %v1595_v28 }
 0x2d3   : > { %v1642_v33 = vsub.f32 %v3670_v37, %v1604_v5  ;;  %v1719_v34 = vsel %vm1553_vm14, %v3774_v21, 0.0 }
 0x2d4   : > { %v3780_v9 = vpop.eup %2965  ;;  %v1676_v36 = vmul.f32 1.442695, %v1639_v32  ;;  %1720 = vadd.xlane.f32.xlu0 %v1719_v34 }
 0x2d5   : > { %v3782_v39 = vpop.eup %2967  ;;  %v1682_v41 = vmul.f32 1.442695, %v1642_v33  ;;  %v1725_v42 = vsel %vm1553_vm14, %v3780_v9, 0.0 }
 0x2d6   : > { %2969 = vpow2.f32 %v1676_v36  ;;  %1726 = vadd.xlane.f32.xlu1 %v1725_v42  ;;  %v1734_v35 = vsel %vm1553_vm14, %v3782_v39, 0.0 }
 0x2d7   : > { %2971 = vpow2.f32 %v1682_v41  ;;  %1735 = vadd.xlane.f32.xlu2 %v1734_v35  ;;  %v1586_v37 = vpop.xlane.xlu1 %1585 }
 0x2d8   : > { %v1636_v44 = vsub.f32 %v3677_v20, %v1586_v37 }
 0x2da   : > { %v1670_v45 = vmul.f32 1.442695, %v1636_v44  ;;  %v1607_v59 = vpop.xlane.xlu0 %1606 }
 0x2db   : > { %v1643_v13 = vsub.f32 %v3682_v43, %v1607_v59 }
 0x2dc   : > { %v3790_v15 = vpop.eup %2969  ;;  %2973 = vpow2.f32 %v1670_v45 }
 0x2dd   : > { %v3792_v60 = vpop.eup %2971  ;;  %v1684_v1 = vmul.f32 1.442695, %v1643_v13  ;;  %v1737_v7 = vsel %vm1553_vm14, %v3790_v15, 0.0 }
 0x2de   : > { %v1746_v8 = vsel %vm1553_vm14, %v3792_v60, 0.0 }
 0x2df   : > { %2975 = vpow2.f32 %v1684_v1  ;;  %1747 = vadd.xlane.f32.xlu0 %v1746_v8  ;;  %1738 = vadd.xlane.f32.xlu2 %v1737_v7  ;;  %v1616_v20 = vpop.xlane.xlu1 %1615  ;;  %v1598_v17 = vpop.xlane.xlu2 %1597 }
 0x2e0   : > { %v1640_v62 = vsub.f32 %v3690_v0, %v1598_v17  ;;  %v1646_v35 = vsub.f32 %v3687_v57, %v1616_v20 }
 0x2e2   : > { %v3799_v43 = vpop.eup %2973  ;;  %v1678_v18 = vmul.f32 1.442695, %v1640_v62 }
 0x2e3   : > { %v1728_v2 = vsel %vm1553_vm14, %v3799_v43, 0.0 }
 0x2e4   : > { %1729 = vadd.xlane.f32.xlu1 %v1728_v2  ;;  %2977 = vpow2.f32 %v1678_v18 }
 0x2e5   : > { %v3803_v24 = vpop.eup %2975 }
 0x2e6   : > { %v1749_v27 = vsel %vm1553_vm14, %v3803_v24, 0.0 }
 0x2e7   : > { %1750 = vadd.xlane.f32.xlu0 %v1749_v27  ;;  %v1610_v28 = vpop.xlane.xlu0 %1609  ;;  %v1589_v5 = vpop.xlane.xlu1 %1588 }
 0x2e8   : > { %v1644_v32 = vsub.f32 %v3703_v11, %v1610_v28  ;;  %v1637_v0 = vsub.f32 %v3697_v4, %v1589_v5  ;;  %v1601_v33 = vpop.xlane.xlu2 %1600  ;;  %v1690_v11 = vmul.f32 1.442695, %v1646_v35 }
 0x2e9   : > { %v1641_v34 = vsub.f32 %v3700_v10, %v1601_v33 }
 0x2ea   : > { %v1686_v36 = vmul.f32 1.442695, %v1644_v32  ;;  %v1672_v41 = vmul.f32 1.442695, %v1637_v0  ;;  %v3810_v42 = vpop.eup %2977 }
 0x2eb   : > { %v1680_v37 = vmul.f32 1.442695, %v1641_v34  ;;  %v1740_v44 = vsel %vm1553_vm14, %v3810_v42, 0.0 }
 0x2ec   : > { %2979 = vpow2.f32 %v1686_v36  ;;  %1741 = vadd.xlane.f32.xlu2 %v1740_v44 }
 0x2ed   : > { %2981 = vpow2.f32 %v1672_v41 }
 0x2ee   : > { %2983 = vpow2.f32 %v1680_v37 }
 0x2ef   : > { %v1622_v45 = vpop.xlane.xlu0 %1621  ;;  %v1619_v59 = vpop.xlane.xlu1 %1618  ;;  %2985 = vpow2.f32 %v1690_v11 }
 0x2f0   : > { %v1648_v4 = vsub.f32 %v3718_v31, %v1622_v45  ;;  %v1613_v10 = vpop.xlane.xlu2 %1612  ;;  %v1647_v8 = vsub.f32 %v3712_v22, %v1619_v59 }
 0x2f1   : > { %v1645_v13 = vsub.f32 %v3715_v26, %v1613_v10 }
 0x2f2   : > { %v3817_v1 = vpop.eup %2979  ;;  %v1694_v7 = vmul.f32 1.442695, %v1648_v4  ;;  %v1692_v18 = vmul.f32 1.442695, %v1647_v8 }
 0x2f3   : > { %v3819_v57 = vpop.eup %2981  ;;  %v1688_v20 = vmul.f32 1.442695, %v1645_v13  ;;  %v1752_v17 = vsel %vm1553_vm14, %v3817_v1, 0.0 }
 0x2f4   : > { %v3824_v62 = vpop.eup %2983  ;;  %2987 = vpow2.f32 %v1694_v7  ;;  %1753 = vadd.xlane.f32.xlu0 %v1752_v17  ;;  %v1731_v31 = vsel %vm1553_vm14, %v3819_v57, 0.0 }
 0x2f5   : > { %1732 = vadd.xlane.f32.xlu1 %v1731_v31  ;;  %v1743_v26 = vsel %vm1553_vm14, %v3824_v62, 0.0  ;;  %2989 = vpow2.f32 %v1688_v20  ;;  %v3830_v22 = vpop.eup %2985 }
 0x2f6   : > { %1744 = vadd.xlane.f32.xlu2 %v1743_v26  ;;  %2991 = vpow2.f32 %v1692_v18  ;;  %v1758_v0 = vsel %vm1553_vm14, %v3830_v22, 0.0 }
 0x2f8   : > { %v1625_v2 = vpop.xlane.xlu2 %1624 }
 0x2f9   : > { %v1649_v28 = vsub.f32 %v3727_v38, %v1625_v2 }
 0x2fa   : > { %v3832_v27 = vpop.eup %2987 }
 0x2fb   : > { %v1764_v5 = vsel %vm1553_vm14, %v3832_v27, 0.0  ;;  %v3837_v32 = vpop.eup %2989  ;;  %v1696_v34 = vmul.f32 1.442695, %v1649_v28 }
 0x2fc   : > { %1765 = vadd.xlane.f32.xlu0 %v1764_v5  ;;  %v1755_v33 = vsel %vm1553_vm14, %v3837_v32, 0.0  ;;  %v3843_v36 = vpop.eup %2991 }
 0x2fd   : > { %1759 = vadd.xlane.f32.xlu1 %v1758_v0  ;;  %2993 = vpow2.f32 %v1696_v34  ;;  %v1761_v38 = vsel %vm1553_vm14, %v3843_v36, 0.0 }
 0x2fe   : > { %1756 = vadd.xlane.f32.xlu2 %v1755_v33 }
 0x303   : > { %v3847_v41 = vpop.eup %2993 }
 0x304   : > { %v1767_v35 = vsel %vm1553_vm14, %v3847_v41, 0.0 }
 0x305   : > { %1762 = vadd.xlane.f32.xlu1 %v1761_v38 }
 0x30d   : > { %1768 = vadd.xlane.f32.xlu1 %v1767_v35 }
 0x329   : > { %v1703_v37 = vpop.xlane.xlu0 %1702 }
 0x32a   : > { %2995 = vrcp.f32 %v1703_v37 }
 0x32c   : > { %v1700_v44 = vpop.xlane.xlu1 %1699 }
 0x32d   : > { %2997 = vrcp.f32 %v1700_v44 }
 0x330   : > { %v2996_v11 = vpop.eup %2995 }
 0x331   : > { %v1795_v45 = vmul.f32 %v2996_v11, %v3734_v3  ;;  %v1715_v4 = vpop.xlane.xlu0 %1714 }
 0x332   : > { %2999 = vrcp.f32 %v1715_v4 }
 0x333   : > { %v2998_v59 = vpop.eup %2997  ;;  %2824 = vmatmul.msk.f32.vlgmr.msra.gmra.mxu1 %vm1553_vm14, %v1795_v45 }
 0x334   : > { %v1794_v10 = vmul.f32 %v2998_v59, %v3739_v58  ;;  %2043 = vmatpush.msra.mxu1 %v3580_v49  ;;  %v1712_v13 = vpop.xlane.xlu1 %1711 }
 0x335   : > { %3001 = vrcp.f32 %v1712_v13 }
 0x336   : > { %2823 = vmatmul.msk.f32.vlgmr.msra.gmra.mxu0 %vm1553_vm14, %v1794_v10 }
 0x337   : > { %2020 = vmatpush.msra.mxu0 %v3576_v47  ;;  %v1706_v7 = vpop.xlane.xlu2 %1705 }
 0x338   : > { %v3000_v8 = vpop.eup %2999  ;;  %3003 = vrcp.f32 %v1706_v7 }
 0x339   : > { %v1799_v3 = vmul.f32 %v3000_v8, %v3744_v23 }
 0x33b   : > { %v3002_v20 = vpop.eup %3001  ;;  %2828 = vmatmul.msk.f32.vlgmr.msrb.gmra.mxu1 %vm1553_vm14, %v1799_v3 }
 0x33c   : > { %v1798_v17 = vmul.f32 %v3002_v20, %v3748_v25  ;;  %2135 = vmatpush.msrb.mxu1 %v3578_v48 }
 0x33e   : > { %v3004_v58 = vpop.eup %3003  ;;  %2827 = vmatmul.msk.f32.vlgmr.msrb.gmra.mxu0 %vm1553_vm14, %v1798_v17 }
 0x33f   : > { %v1796_v49 = vmul.f32 %v3004_v58, %v3754_v40  ;;  %2112 = vmatpush.msrb.mxu0 %v3574_v46  ;;  %v1718_v47 = vpop.xlane.xlu0 %1717 }
 0x340   : > { %3005 = vrcp.f32 %v1718_v47  ;;  %v1709_v31 = vpop.xlane.xlu2 %1708 }
 0x341   : > { %3007 = vrcp.f32 %v1709_v31  ;;  %v1724_v26 = vpop.xlane.xlu1 %1723  ;;  %2825 = vmatmul.msk.f32.vlgmr.msra.gmra.mxu2 %vm1553_vm14, %v1796_v49 }
 0x342   : > { %3009 = vrcp.f32 %v1724_v26  ;;  %2066 = vmatpush.msra.mxu2 %v3588_v30 }
 0x346   : > { %v3006_v23 = vpop.eup %3005 }
 0x347   : > { %v3008_v25 = vpop.eup %3007  ;;  %v1800_v48 = vmul.f32 %v3006_v23, %v3760_v56  ;;  %v1721_v18 = vpop.xlane.xlu0 %1720 }
 0x348   : > { %v3010_v2 = vpop.eup %3009  ;;  %v1797_v40 = vmul.f32 %v3008_v25, %v3764_v12  ;;  %3011 = vrcp.f32 %v1721_v18 }
 0x349   : > { %v1802_v46 = vmul.f32 %v3010_v2, %v3768_v16  ;;  %v1727_v28 = vpop.xlane.xlu1 %1726  ;;  %2829 = vmatmul.msk.f32.vlgmr.msrb.gmra.mxu2 %vm1553_vm14, %v1800_v48 }
 0x34a   : > { %3013 = vrcp.f32 %v1727_v28  ;;  %2826 = vmatmul.msk.f32.vlgmr.msra.gmra.mxu3 %vm1553_vm14, %v1797_v40  ;;  %2158 = vmatpush.msrb.mxu2 %v3584_v51  ;;  %v1736_v30 = vpop.xlane.xlu2 %1735 }
 0x34b   : > { %2089 = vmatpush.msra.mxu3 %v3596_v54  ;;  %3015 = vrcp.f32 %v1736_v30  ;;  %2831 = vmatmul.msk.f32.vlgmr.msra.gmra.mxu0 %vm1553_vm14, %v1802_v46 }
 0x34c   : > { %2204 = vmatpush.msra.mxu0 %v3582_v50 }
 0x34e   : > { %v3012_v56 = vpop.eup %3011 }
 0x34f   : > { %v1801_v12 = vmul.f32 %v3012_v56, %v3774_v21 }
 0x350   : > { %v3014_v16 = vpop.eup %3013 }
 0x351   : > { %v3016_v5 = vpop.eup %3015  ;;  %v1803_v0 = vmul.f32 %v3014_v16, %v3780_v9 }
 0x352   : > { %v1806_v33 = vmul.f32 %v3016_v5, %v3782_v39  ;;  %v1748_v34 = vpop.xlane.xlu0 %1747  ;;  %2830 = vmatmul.msk.f32.vlgmr.msrb.gmra.mxu3 %vm1553_vm14, %v1801_v12  ;;  %v1739_v51 = vpop.xlane.xlu2 %1738  ;;  %v2932_v5 = vld [vmem:[%s4102_s6] ss:$0 sm:$0xff] }
 0x353   : > { %3017 = vrcp.f32 %v1748_v34  ;;  %2181 = vmatpush.msrb.mxu3 %v3592_v52  ;;  %2832 = vmatmul.msk.f32.vlgmr.msra.gmra.mxu1 %vm1553_vm14, %v1803_v0 }
 0x354   : > { %3019 = vrcp.f32 %v1739_v51  ;;  %2835 = vmatmul.msk.f32.vlgmr.msrb.gmra.mxu0 %vm1553_vm14, %v1806_v33  ;;  %2227 = vmatpush.msra.mxu1 %v3590_v19 }
 0x355   : > { %2296 = vmatpush.msrb.mxu0 %v3586_v29 }
 0x357   : > { %v1730_v50 = vpop.xlane.xlu1 %1729 }
 0x358   : > { %3021 = vrcp.f32 %v1730_v50 }
 0x359   : > { %v3018_v54 = vpop.eup %3017 }
 0x35a   : > { %v3020_v21 = vpop.eup %3019  ;;  %v1810_v9 = vmul.f32 %v3018_v54, %v3792_v60  ;;  %v1751_v39 = vpop.xlane.xlu0 %1750 }
 0x35b   : > { %v1807_v38 = vmul.f32 %v3020_v21, %v3790_v15  ;;  %3023 = vrcp.f32 %v1751_v39 }
 0x35c   : > { %2839 = vmatmul.msk.f32.vlgmr.msra.gmra.mxu0 %vm1553_vm14, %v1810_v9 }
 0x35d   : > { %2836 = vmatmul.msk.f32.vlgmr.msrb.gmra.mxu1 %vm1553_vm14, %v1807_v38 }
 0x35e   : > { %v3022_v52 = vpop.eup %3021  ;;  %2319 = vmatpush.msrb.mxu1 %v3594_v53 }
 0x35f   : > { %v1804_v19 = vmul.f32 %v3022_v52, %v3799_v43  ;;  %v1742_v29 = vpop.xlane.xlu2 %1741  ;;  %v3051_v52 = vld [vmem:[%s3341_s19] sm:$0xff] }
 0x360   : > { %3025 = vrcp.f32 %v1742_v29 }
 0x361   : > { %v3024_v35 = vpop.eup %3023  ;;  %2833 = vmatmul.msk.f32.vlgmr.msra.gmra.mxu2 %vm1553_vm14, %v1804_v19 }
 0x362   : > { %v1811_v60 = vmul.f32 %v3024_v35, %v3803_v24  ;;  %2250 = vmatpush.msra.mxu2 %v3598_v55 }
 0x365   : > { %2840 = vmatmul.msk.f32.vlgmr.msra.gmra.mxu1 %vm1553_vm14, %v1811_v60 }
 0x366   : > { %v3026_v15 = vpop.eup %3025 }
 0x367   : > { %v1754_v37 = vpop.xlane.xlu0 %1753  ;;  %v1808_v44 = vmul.f32 %v3026_v15, %v3810_v42 }
 0x368   : > { %3027 = vrcp.f32 %v1754_v37  ;;  %v1733_v11 = vpop.xlane.xlu1 %1732 }
 0x369   : > { %3029 = vrcp.f32 %v1733_v11  ;;  %v1745_v53 = vpop.xlane.xlu2 %1744  ;;  %2837 = vmatmul.msk.f32.vlgmr.msrb.gmra.mxu2 %vm1553_vm14, %v1808_v44 }
 0x36a   : > { %2342 = vmatpush.msrb.mxu2 %v3610_v61  ;;  %3031 = vrcp.f32 %v1745_v53 }
 0x36e   : > { %v3028_v43 = vpop.eup %3027 }
 0x36f   : > { %v3030_v45 = vpop.eup %3029  ;;  %v1812_v24 = vmul.f32 %v3028_v43, %v3817_v1  ;;  %v1766_v55 = vpop.xlane.xlu0 %1765 }
 0x370   : > { %v1805_v4 = vmul.f32 %v3030_v45, %v3819_v57  ;;  %3033 = vrcp.f32 %v1766_v55  ;;  %v1760_v59 = vpop.xlane.xlu1 %1759  ;;  %v3032_v10 = vpop.eup %3031 }
 0x371   : > { %3035 = vrcp.f32 %v1760_v59  ;;  %2841 = vmatmul.msk.f32.vlgmr.msra.gmra.mxu2 %vm1553_vm14, %v1812_v24  ;;  %v1757_v42 = vpop.xlane.xlu2 %1756  ;;  %v1809_v1 = vmul.f32 %v3032_v10, %v3824_v62  ;;  %v3052_v24 = vld [vmem:[%s3341_s19 + $0x10] sm:$0xff] }
 0x372   : > { %2834 = vmatmul.msk.f32.vlgmr.msra.gmra.mxu3 %vm1553_vm14, %v1805_v4  ;;  %3037 = vrcp.f32 %v1757_v42  ;;  %v3053_v4 = vld [vmem:[%s3341_s19 + $0x8] sm:$0xff] }
 0x373   : > { %2273 = vmatpush.msra.mxu3 %v3615_v63 }
 0x376   : > { %v3034_v61 = vpop.eup %3033 }
 0x377   : > { %v3036_v13 = vpop.eup %3035  ;;  %v1816_v7 = vmul.f32 %v3034_v61, %v3832_v27 }
 0x378   : > { %v1814_v57 = vmul.f32 %v3036_v13, %v3830_v22  ;;  %v1763_v8 = vpop.xlane.xlu1 %1762  ;;  %v3038_v63 = vpop.eup %3037 }
 0x379   : > { %3039 = vrcp.f32 %v1763_v8  ;;  %2845 = vmatmul.msk.f32.vlgmr.msrb.gmra.mxu2 %vm1553_vm14, %v1816_v7  ;;  %v1813_v20 = vmul.f32 %v3038_v63, %v3837_v32 }
 0x37a   : > { %2838 = vmatmul.msk.f32.vlgmr.msrb.gmra.mxu3 %vm1553_vm14, %v1809_v1  ;;  %2843 = vmatmul.msk.f32.vlgmr.msrb.gmra.mxu0 %vm1553_vm14, %v1814_v57 }
 0x37b   : > { %2365 = vmatpush.msrb.mxu3 %v3627_v6 }
 0x37f   : > { %v3040_v3 = vpop.eup %3039 }
 0x380   : > { %v1815_v27 = vmul.f32 %v3040_v3, %v3843_v36  ;;  %v1769_v17 = vpop.xlane.xlu1 %1768 }
 0x381   : > { %3041 = vrcp.f32 %v1769_v17 }
 0x382   : > { %2842 = vmatmul.msk.f32.vlgmr.msra.gmra.mxu3 %vm1553_vm14, %v1813_v20  ;;  %2844 = vmatmul.msk.f32.vlgmr.msrb.gmra.mxu1 %vm1553_vm14, %v1815_v27  ;;  %v3054_v20 = vld [vmem:[%s3341_s19 + $0x18] sm:$0xff]  ;;  %s2856_s19 = sshll.u32 %s3285_s29, 5  ;;  %s2617_s29 = scalar_lea.sflag [#allocation4], %s466_s21 }
 0x383   : > { %s2628_s24 = scalar_lea.hbm %s4109_s13, %s2856_s19  ;;  %s3135_s19 = scalar_lea.hbm %s4109_s13, 64 }
 0x384   : > { %s2631_s15 = sshll.u32 %s2628_s24, 4  ;;  %s2632_s15 = int_to_ptr.hbm [resolvable:$true] %s2631_s15 }
 0x385   : > { %s3129_s16 = sshra.s32 %s2632_s15, 4  ;;  %s3130_s16 = int_to_ptr.hbm [resolvable:$true] %s3129_s16 }
 0x386   : > { %s3131_s22 = scalar_lea.hbm %s3130_s16, 32  ;;  %p3136_p3 = scmp.lt.s32.totalorder %s3130_s16, %s4109_s13 }
 0x387   : > { %v3042_v62 = vpop.eup %3041  ;;  %p3132_p0 = scmp.ne.s32.totalorder %s3130_s16, %s3131_s22  ;;  %p3137_p4 = scmp.lt.s32.totalorder %s3135_s19, %s3131_s22 }
 0x388   : > { %v1817_v22 = vmul.f32 %v3042_v62, %v3847_v41 }
 0x389   : > { %p3133_p1 = pnand %p3132_p0, %p3302_p5  ;;  %p3138_p7 = por %p3137_p4, %p3136_p3 }
 0x38a   : > { %2846 = vmatmul.msk.f32.vlgmr.msrb.gmra.mxu3 %vm1553_vm14, %v1817_v22 }
 0x38b   : > { %p3134_p2 = pneg %p3133_p1 }
 0x38d   : > { %p3139_p8 = pnand %p3138_p7, %p3134_p2 }
 0x3b0   : > { %v1861_v49 = vpop.f32.mrf.mxu1 }
 0x3b3   : > { %v1838_v58 = vpop.f32.mrf.mxu0 }
 0x3b8   : > { %v1953_v31 = vpop.f32.mrf.mxu1 }
 0x3b9   : > { %v2371_v51 = vadd.f32 %v1953_v31, %v1861_v49 }
 0x3bb   : > { %v1930_v47 = vpop.f32.mrf.mxu0 }
 0x3bc   : > { %v2370_v28 = vadd.f32 %v1930_v47, %v1838_v58 }
 0x3c4   : > { %v1884_v6 = vpop.f32.mrf.mxu2 }
 0x3c8   : > { %v2022_v26 = vpop.f32.mrf.mxu0 }
 0x3c9   : > { %v2374_v30 = vadd.f32 %v2370_v28, %v2022_v26 }
 0x3cc   : > { %v1976_v32 = vpop.f32.mrf.mxu2 }
 0x3cd   : > { %v1907_v23 = vpop.f32.mrf.mxu3  ;;  %v2372_v0 = vadd.f32 %v1976_v32, %v1884_v6 }
 0x3d0   : > { %v2045_v36 = vpop.f32.mrf.mxu1 }
 0x3d1   : > { %v2114_v48 = vpop.f32.mrf.mxu0  ;;  %v2375_v21 = vadd.f32 %v2371_v51, %v2045_v36 }
 0x3d2   : > { %v2378_v41 = vadd.f32 %v2374_v30, %v2114_v48 }
 0x3d5   : > { %v1999_v18 = vpop.f32.mrf.mxu3 }
 0x3d6   : > { %v2373_v61 = vadd.f32 %v1999_v18, %v1907_v23 }
 0x3d9   : > { %v2206_v46 = vpop.f32.mrf.mxu0 }
 0x3da   : > { %v2137_v2 = vpop.f32.mrf.mxu1  ;;  %v2382_v16 = vadd.f32 %v2378_v41, %v2206_v46 }
 0x3db   : > { %v2379_v38 = vadd.f32 %v2375_v21, %v2137_v2 }
 0x3e2   : > { %v2229_v33 = vpop.f32.mrf.mxu1 }
 0x3e3   : > { %v2383_v60 = vadd.f32 %v2379_v38, %v2229_v33 }
 0x3e4   : > { %v2068_v25 = vpop.f32.mrf.mxu2 }
 0x3e5   : > { %v2376_v54 = vadd.f32 %v2372_v0, %v2068_v25 }
 0x3ec   : > { %v2160_v40 = vpop.f32.mrf.mxu2 }
 0x3ed   : > { %v2380_v39 = vadd.f32 %v2376_v54, %v2160_v40 }
 0x3f4   : > { %v2252_v12 = vpop.f32.mrf.mxu2 }
 0x3f5   : > { %v2091_v56 = vpop.f32.mrf.mxu3  ;;  %v2384_v29 = vadd.f32 %v2380_v39, %v2252_v12  ;;  %v2508_v12 = vld [vmem:[%s4105_s9 + $0x10] sm:$0xff] }
 0x3f6   : > { %v2377_v7 = vadd.f32 %v2373_v61, %v2091_v56  ;;  %v2509_v56 = vld [vmem:[%s4105_s9 + $0x18] sm:$0xff] }
 0x3f7   : > { %v2298_v34 = vpop.f32.mrf.mxu0  ;;  %2538 = vmatpush.msra.mxu0 %v2509_v56  ;;  %v2565_v56 = vld [vmem:[%s4107_s11 + $0x30] sm:$0xff] }
 0x3f8   : > { %v2386_v50 = vadd.f32 %v2382_v16, %v2298_v34  ;;  %v2507_v16 = vld [vmem:[%s4105_s9 + $0x8] sm:$0xff] }
 0x3f9   : > { %2539 = vmatpush.msra.mxu0 %v2508_v12 }
 0x3fa   : > { %v2394_v9 = vadd.f32 %v2932_v5, %v2386_v50 }
 0x3fb   : > { %2540 = vmatpush.msra.mxu0 %v2507_v16 }
 0x3fc   : > { %v3919_v19 = vadd.f32 %v3051_v52, %v2394_v9  ;;  %v2344_v15 = vpop.f32.mrf.mxu2 }
 0x3fd   : > { %v2183_v35 = vpop.f32.mrf.mxu3  ;;  %v2388_v44 = vadd.f32 %v2384_v29, %v2344_v15 }
 0x3fe   : > { %v2404_v37 = vsel %vm482_vm0, %v3919_v19, 0.0  ;;  %v2381_v1 = vadd.f32 %v2377_v7, %v2183_v35 }
 0x3ff   : > { %2405 = vadd.xlane.f32.xlu2 %v2404_v37  ;;  %v2321_v11 = vpop.f32.mrf.mxu1  ;;  %v2396_v43 = vadd.f32 %v2932_v5, %v2388_v44 }
 0x400   : > { %v2387_v53 = vadd.f32 %v2383_v60, %v2321_v11  ;;  %v3984_v11 = vld [vmem:[%s4103_s7] ss:$0 sm:$0xff] }
 0x401   : > { %v3924_v55 = vadd.f32 %v3052_v24, %v2396_v43  ;;  %v2574_v24 = vld [vmem:[%s4107_s11 + $0x78] sm:$0xff] }
 0x402   : > { %v2395_v45 = vadd.f32 %v2932_v5, %v2387_v53  ;;  %2579 = vmatpush.msra.mxu1 %v2574_v24 }
 0x403   : > { %v2410_v42 = vsel %vm482_vm0, %v3924_v55, 0.0 }
 0x404   : > { %v3927_v59 = vadd.f32 %v3053_v4, %v2395_v45  ;;  %2411 = vadd.xlane.f32.xlu1 %v2410_v42  ;;  %v2573_v4 = vld [vmem:[%s4107_s11 + $0x70] sm:$0xff] }
 0x405   : > { %v2275_v10 = vpop.f32.mrf.mxu3  ;;  %2580 = vmatpush.msra.mxu1 %v2573_v4 }
 0x406   : > { %v2407_v13 = vsel %vm482_vm0, %v3927_v59, 0.0  ;;  %v2385_v57 = vadd.f32 %v2381_v1, %v2275_v10 }
 0x407   : > { %2408 = vadd.xlane.f32.xlu0 %v2407_v13 }
 0x40d   : > { %v2367_v8 = vpop.f32.mrf.mxu3 }
 0x40e   : > { %v2389_v63 = vadd.f32 %v2385_v57, %v2367_v8  ;;  %v2934_v57 = vld [vmem:[%s4104_s8] ss:$0 sm:$0xff]  ;;  %v2572_v8 = vld [vmem:[%s4107_s11 + $0x68] sm:$0xff] }
 0x40f   : > { %2581 = vmatpush.msra.mxu1 %v2572_v8 }
 0x410   : > { %v2397_v3 = vadd.f32 %v2932_v5, %v2389_v63  ;;  %v2506_v5 = vld [vmem:[%s4105_s9] sm:$0xff] }
 0x411   : > { %2541 = vmatpush.msra.mxu0 %v2506_v5 }
 0x412   : > { %v3934_v27 = vadd.f32 %v3054_v20, %v2397_v3 }
 0x414   : > { %v2413_v17 = vsel %vm482_vm0, %v3934_v27, 0.0 }
 0x415   : > { %2414 = vadd.xlane.f32.xlu2 %v2413_v17 }
 0x472   : > { %v2406_v62 = vpop.xlane.xlu2 %2405 }
 0x473   : > { %v2416_v22 = vmul.f32 %v2406_v62, %v3351_v14  ;;  %v2571_v62 = vld [vmem:[%s4107_s11 + $0x60] sm:$0xff] }
 0x474   : > { %2582 = vmatpush.msra.mxu1 %v2571_v62 }
 0x475   : > { %v3940_v58 = vsub.f32 %v3919_v19, %v2416_v22 }
 0x477   : > { %v2424_v49 = vmul.f32 %v3940_v58, %v3940_v58  ;;  %v2412_v6 = vpop.xlane.xlu1 %2411 }
 0x478   : > { %v2418_v31 = vmul.f32 %v2412_v6, %v3351_v14 }
 0x479   : > { %v2428_v47 = vsel %vm482_vm0, %v2424_v49, 0.0 }
 0x47a   : > { %v2409_v26 = vpop.xlane.xlu0 %2408  ;;  %2429 = vadd.xlane.f32.xlu0 %v2428_v47  ;;  %v3948_v23 = vsub.f32 %v3924_v55, %v2418_v31  ;;  %v2569_v47 = vld [vmem:[%s4107_s11 + $0x50] sm:$0xff] }
 0x47b   : > { %v2417_v32 = vmul.f32 %v2409_v26, %v3351_v14 }
 0x47c   : > { %v2426_v25 = vmul.f32 %v3948_v23, %v3948_v23 }
 0x47d   : > { %v3951_v36 = vsub.f32 %v3927_v59, %v2417_v32  ;;  %v2568_v32 = vld [vmem:[%s4107_s11 + $0x48] sm:$0xff] }
 0x47e   : > { %v2434_v18 = vsel %vm482_vm0, %v2426_v25, 0.0 }
 0x47f   : > { %v2425_v48 = vmul.f32 %v3951_v36, %v3951_v36  ;;  %2435 = vadd.xlane.f32.xlu2 %v2434_v18 }
 0x481   : > { %v2431_v2 = vsel %vm482_vm0, %v2425_v48, 0.0 }
 0x482   : > { %2432 = vadd.xlane.f32.xlu1 %v2431_v2  ;;  %v2567_v2 = vld [vmem:[%s4107_s11 + $0x40] sm:$0xff] }
 0x488   : > { %v2415_v40 = vpop.xlane.xlu2 %2414 }
 0x489   : > { %v2419_v46 = vmul.f32 %v2415_v40, %v3351_v14 }
 0x48b   : > { %v3961_v28 = vsub.f32 %v3934_v27, %v2419_v46 }
 0x48d   : > { %v2427_v30 = vmul.f32 %v3961_v28, %v3961_v28 }
 0x48f   : > { %v2437_v41 = vsel %vm482_vm0, %v2427_v30, 0.0 }
 0x490   : > { %2438 = vadd.xlane.f32.xlu0 %v2437_v41 }
 0x4ed   : > { %v2430_v0 = vpop.xlane.xlu0 %2429 }
 0x4ee   : > { %v2440_v33 = vmul.f32 %v2430_v0, %v3351_v14  ;;  %v2563_v0 = vld [vmem:[%s4107_s11 + $0x20] sm:$0xff] }
 0x4f0   : > { %v2444_v34 = vadd.f32 1e-05, %v2440_v33 }
 0x4f2   : > { %3043 = vrsqrt.f32 %v2444_v34  ;;  %v2436_v51 = vpop.xlane.xlu2 %2435  ;;  %vm2454_vm1 = vweird.f32 %v2444_v34 }
 0x4f3   : > { %v2442_v50 = vmul.f32 %v2436_v51, %v3351_v14  ;;  %v2562_v51 = vld [vmem:[%s4107_s11 + $0x18] sm:$0xff] }
 0x4f5   : > { %v2433_v54 = vpop.xlane.xlu1 %2432  ;;  %v2446_v9 = vadd.f32 1e-05, %v2442_v50 }
 0x4f6   : > { %v2441_v21 = vmul.f32 %v2433_v54, %v3351_v14 }
 0x4f7   : > { %3045 = vrsqrt.f32 %v2446_v9  ;;  %vm2474_vm7 = vweird.f32 %v2446_v9 }
 0x4f8   : > { %v3044_v39 = vpop.eup %3043  ;;  %v2445_v38 = vadd.f32 1e-05, %v2441_v21 }
 0x4f9   : > { %v2449_v52 = vmul.f32 %v3044_v39, %v2444_v34  ;;  %vm2455_vm15 = vweird.f32 %v3044_v39 }
 0x4fa   : > { %3047 = vrsqrt.f32 %v2445_v38  ;;  %vm2456_vm2 = vmor %vm2454_vm1, %vm2455_vm15  ;;  %vm2464_vm5 = vweird.f32 %v2445_v38 }
 0x4fb   : > { %v2450_v29 = vmul.f32 %v3044_v39, %v2449_v52  ;;  %v2935_v52 = vld [vmem:[%s4106_s10] ss:$0 sm:$0xff] }
 0x4fd   : > { %v2451_v35 = vmul.f32 0.5, %v2450_v29  ;;  %v3046_v60 = vpop.eup %3045 }
 0x4fe   : > { %v2469_v44 = vmul.f32 %v3046_v60, %v2446_v9  ;;  %vm2475_vm4 = vweird.f32 %v3046_v60 }
 0x4ff   : > { %v2452_v15 = vsub.f32 1.5, %v2451_v35  ;;  %vm2476_vm8 = vmor %vm2474_vm7, %vm2475_vm4 }
 0x500   : > { %v3048_v37 = vpop.eup %3047  ;;  %v2470_v45 = vmul.f32 %v3046_v60, %v2469_v44 }
 0x501   : > { %v2453_v53 = vmul.f32 %v3044_v39, %v2452_v15  ;;  %v2459_v43 = vmul.f32 %v3048_v37, %v2445_v38  ;;  %vm2465_vm3 = vweird.f32 %v3048_v37  ;;  %v2560_v38 = vld [vmem:[%s4107_s11 + $0x8] sm:$0xff] }
 0x502   : > { %v2471_v7 = vmul.f32 0.5, %v2470_v45  ;;  %vm2466_vm6 = vmor %vm2464_vm5, %vm2465_vm3 }
 0x503   : > { %v2457_v42 = vsel %vm2456_vm2, %v3044_v39, %v2453_v53  ;;  %v2460_v10 = vmul.f32 %v3048_v37, %v2459_v43  ;;  %v2439_v61 = vpop.xlane.xlu0 %2438  ;;  %v2561_v39 = vld [vmem:[%s4107_s11 + $0x10] sm:$0xff] }
 0x504   : > { %v2488_v13 = vmul.f32 %v2457_v42, %v3940_v58  ;;  %v2443_v1 = vmul.f32 %v2439_v61, %v3351_v14  ;;  %v2472_v20 = vsub.f32 1.5, %v2471_v7  ;;  %v2570_v58 = vld [vmem:[%s4107_s11 + $0x58] sm:$0xff]  ;;  %v2936_v42 = vld [vmem:[%s4108_s12] ss:$0 sm:$0xff] }
 0x505   : > { %v2461_v63 = vmul.f32 0.5, %v2460_v10  ;;  %2583 = vmatpush.msra.mxu1 %v2570_v58 }
 0x506   : > { %v2495_v3 = vmul.f32 %v3984_v11, %v2488_v13  ;;  %v2447_v17 = vadd.f32 1e-05, %v2443_v1  ;;  %v2473_v49 = vmul.f32 %v3046_v60, %v2472_v20 }
 0x507   : > { %v2462_v22 = vsub.f32 1.5, %v2461_v63  ;;  %2584 = vmatpush.msra.mxu1 %v2569_v47 }
 0x508   : > { %3049 = vrsqrt.f32 %v2447_v17  ;;  %v2502_v14 = vadd.f32 %v2934_v57, %v2495_v3  ;;  %v2477_v25 = vsel %vm2476_vm8, %v3046_v60, %v2473_v49  ;;  %vm2484_vm10 = vweird.f32 %v2447_v17 }
 0x509   : > { %v2463_v6 = vmul.f32 %v3048_v37, %v2462_v22  ;;  %2585 = vmatpush.msra.mxu1 %v2568_v32  ;;  %v2490_v46 = vmul.f32 %v2477_v25, %v3948_v23  ;;  %v2564_v23 = vld [vmem:[%s4107_s11 + $0x28] sm:$0xff] }
 0x50a   : > { %2847 = vmatmul.msk.f32.vlgmr.msra.gmra.mxu0 %vm482_vm0, %v2502_v14 }
 0x50b   : > { %v2467_v31 = vsel %vm2466_vm6, %v3048_v37, %v2463_v6  ;;  %2586 = vmatpush.msra.mxu1 %v2567_v2  ;;  %v2497_v16 = vmul.f32 %v3984_v11, %v2490_v46 }
 0x50c   : > { %v2489_v26 = vmul.f32 %v2467_v31, %v3951_v36  ;;  %v2566_v36 = vld [vmem:[%s4107_s11 + $0x38] sm:$0xff] }
 0x50d   : > { %2587 = vmatpush.msra.mxu1 %v2566_v36  ;;  %v2504_v34 = vadd.f32 %v2934_v57, %v2497_v16 }
 0x50e   : > { %v3050_v48 = vpop.eup %3049  ;;  %v2496_v18 = vmul.f32 %v3984_v11, %v2489_v26 }
 0x50f   : > { %v2479_v40 = vmul.f32 %v3050_v48, %v2447_v17  ;;  %vm2485_vm9 = vweird.f32 %v3050_v48  ;;  %2588 = vmatpush.msra.mxu1 %v2565_v56 }
 0x510   : > { %v2503_v30 = vadd.f32 %v2934_v57, %v2496_v18  ;;  %vm2486_vm11 = vmor %vm2484_vm10, %vm2485_vm9 }
 0x511   : > { %v2480_v41 = vmul.f32 %v3050_v48, %v2479_v40  ;;  %2589 = vmatpush.msra.mxu1 %v2564_v23 }
 0x512   : > { %2848 = vmatmul.msk.f32.gmra.mxu0 %vm482_vm0, %v2503_v30 }
 0x513   : > { %v2481_v12 = vmul.f32 0.5, %v2480_v41  ;;  %2590 = vmatpush.msra.mxu1 %v2563_v0 }
 0x515   : > { %v2482_v5 = vsub.f32 1.5, %v2481_v12  ;;  %2591 = vmatpush.msra.mxu1 %v2562_v51 }
 0x517   : > { %v2483_v33 = vmul.f32 %v3050_v48, %v2482_v5  ;;  %2592 = vmatpush.msra.mxu1 %v2561_v39 }
 0x519   : > { %v2487_v50 = vsel %vm2486_vm11, %v3050_v48, %v2483_v33  ;;  %2593 = vmatpush.msra.mxu1 %v2560_v38 }
 0x51a   : > { %v2491_v54 = vmul.f32 %v2487_v50, %v3961_v28  ;;  %2849 = vmatmul.msk.f32.gmra.mxu0 %vm482_vm0, %v2504_v34  ;;  %v2559_v28 = vld [vmem:[%s4107_s11] sm:$0xff] }
 0x51b   : > { %2594 = vmatpush.msra.mxu1 %v2559_v28 }
 0x51c   : > { %v2498_v21 = vmul.f32 %v3984_v11, %v2491_v54 }
 0x51e   : > { %v2505_v9 = vadd.f32 %v2934_v57, %v2498_v21 }
 0x522   : > { %2850 = vmatmul.msk.f32.gmra.mxu0 %vm482_vm0, %v2505_v9 }
 0x587   : > { %v2543_v29 = vpop.f32.mrf.mxu0 }
 0x588   : > { %v2544_v35 = vadd.f32 %v2935_v52, %v2543_v29 }
 0x58a   : > { %v2555_v60 = vmax.f32 %v2544_v35, 0.0 }
 0x58c   : > { %2595 = vmatmul.f32.vlgmr.msra.gmra.mxu1 %v2555_v60 }
 0x58f   : > { %v2546_v15 = vpop.f32.mrf.mxu0 }
 0x590   : > { %v2547_v37 = vadd.f32 %v2935_v52, %v2546_v15 }
 0x592   : > { %v2556_v44 = vmax.f32 %v2547_v37, 0.0 }
 0x594   : > { %2598 = vmatmul.f32.gmra.mxu1 %v2556_v44 }
 0x597   : > { %v2549_v11 = vpop.f32.mrf.mxu0 }
 0x598   : > { %v2550_v53 = vadd.f32 %v2935_v52, %v2549_v11 }
 0x59a   : > { %v2557_v43 = vmax.f32 %v2550_v53, 0.0 }
 0x59c   : > { %2601 = vmatmul.f32.gmra.mxu1 %v2557_v43 }
 0x59f   : > { %v2552_v45 = vpop.f32.mrf.mxu0 }
 0x5a0   : > { %v2553_v24 = vadd.f32 %v2935_v52, %v2552_v45 }
 0x5a2   : > { %v2558_v4 = vmax.f32 %v2553_v24, 0.0 }
 0x5a4   : > { %2604 = vmatmul.f32.gmra.mxu1 %v2558_v4 }
 0x609   : > { %v2596_v10 = vpop.f32.mrf.mxu1 }
 0x60a   : > { %v2597_v61 = vadd.f32 %v2936_v42, %v2596_v10 }
 0x60c   : > { %v2608_v13 = vadd.f32 %v2597_v61, %v3919_v19 }
 0x60e   : > { %2612 = vst.msk [vmem:[%s468_s17] sm:$0xff] %vm482_vm0, %v2608_v13 }
 0x611   : > { %v2599_v7 = vpop.f32.mrf.mxu1 }
 0x612   : > { %v2600_v1 = vadd.f32 %v2936_v42, %v2599_v7 }
 0x614   : > { %v2609_v57 = vadd.f32 %v2600_v1, %v3927_v59 }
 0x616   : > { %2613 = vst.msk [vmem:[%s468_s17 + $0x8] sm:$0xff] %vm482_vm0, %v2609_v57 }
 0x619   : > { %v2602_v8 = vpop.f32.mrf.mxu1 }
 0x61a   : > { %v2603_v63 = vadd.f32 %v2936_v42, %v2602_v8 }
 0x61c   : > { %v2610_v3 = vadd.f32 %v2603_v63, %v3924_v55 }
 0x61e   : > { %2614 = vst.msk [vmem:[%s468_s17 + $0x10] sm:$0xff] %vm482_vm0, %v2610_v3 }
 0x621   : > { %v2605_v19 = vpop.f32.mrf.mxu1 }
 0x622   : > { %v2606_v20 = vadd.f32 %v2936_v42, %v2605_v19 }
 0x624   : > { %v2611_v59 = vadd.f32 %v2606_v20, %v3934_v27 }
 0x626   : > { %2615 = vst.msk [vmem:[%s468_s17 + $0x18] sm:$0xff] %vm482_vm0, %v2611_v59 }
 0x627   : > { %3142 = shalt.err (!%p3139_p8)
}
 0x628   : > { %s3192_s21 = smov 128   ;;  %s3193_s17 = smov 8  }
 0x629   : > { %2873 = dma.vmem_to_hbm [thread:$0]  (%p3302_p5), %s2630_s30, 512, %s2632_s15, %s2617_s29, %s3192_s21, %s3192_s21, %s3193_s17  }
 0x62a PF: > { %p2890_p9 = scmp.ge.s32.totalorder %s3185_s28, 2  ;;  %s2646_s27 = sand.u32 1, %s3173_s25  }
 0x62b   : > { %s2647_s14 = scalar_lea.sflag [#allocation4], %s2646_s27 }
 0x62c   : > { %p2883_p10 = pnand %p2890_p9, %p3306_p6 }
 0x62e   : > { %p2884_p11 = pneg %p2883_p10 }
 0x630   : > { %3168 = dma.done.wait (%p2884_p11), %s2647_s14, 512  }
 0x631   : > { %3170 = vsyncadd (%p2884_p11), %s2647_s14, 4294966784  ;;  %s4122_s28 = sld [smem:[#allocation12_spill]]  ;;  %s4125_s25 = smov %s3177_s26 }
 0x632   : > { %s4123_s16 = sld [smem:[#allocation11_spill]] }
 0x633   : > { %s4124_s27 = sld [smem:[#allocation13_spill]] }
 0x637   : > { %p25_p12 = scmp.ge.s32.totalorder %s4122_s28, 4  }
 0x638   : > { %s4126_s26 = smov %s4123_s16 }
 0x639   :  { %27 = sbr.rel (!%p25_p12) target bundleno = 5 (0x5), region = 116 }
 0x63e   :  { %2653 = vsyncpa [#allocation3], 1 }
 0x63f   :  { %2655 = vsyncpa [#allocation3 + $0x1], 1 }
 0x640   :  { %2656 = vsyncpa [#allocation6], 1 }
 0x641   :  { %2657 = vsyncpa [#allocation4], 1 }
 0x642   :  { %2659 = vsyncpa [#allocation4 + $0x1], 1 }

</bundles_post_ra>
